<compile_context>
chip_gen: v7x
topology: tpu7x:2x2x1
jax: 0.10.0
libtpu: 0.0.40
codegen_flags: <defaults>
</compile_context>

<pallas_src>
import math

import jax
import jax.numpy as jnp
from jax.experimental import pallas as pl
from jax.experimental.pallas import tpu as pltpu

# ----- model config (XTransformerWithEmbedding defaults at small size) -----
EMBED_DIM = 8
DIM = 64
DEPTH = 4
HEADS = 4                       # seq_len == 1 => heads never mix; kept for doc
NUM_NUMERIC = 6
CAT_NAMES = ("cat_a", "cat_b", "cat_c")
CAT_SIZES = (5, 7, 4)
F_IN = NUM_NUMERIC + EMBED_DIM * len(CAT_NAMES)   # 30

MATMUL_DTYPE = jnp.bfloat16     # MXU operand dtype (accumulation stays f32)
MAX_TB = 1024                   # max batch tile (rows); VMEM is nowhere close
_INV_SQRT2 = 1.0 / math.sqrt(2.0)
_SQRT_2_OVER_PI = math.sqrt(2.0 / math.pi)


def _round_up(x, m):
    return (x + m - 1) // m * m


F_IN_PAD = _round_up(F_IN, 128)  # lane-dense input tile (zero-padded columns)


# --------------------------- kernel-side helpers ---------------------------

def _norm(x, eps=1e-5):
    """LayerNorm without affine (gamma/beta folded into the next Linear).

    One-pass moments: both lane reductions depend only on x (they overlap on
    the XLU) and the extra (x - mu)^2 VPU pass disappears.  maximum() guards
    the tiny negative var that f32 cancellation can produce for near-constant
    rows (e.g. zero-padded batch rows)."""
    s1 = jnp.mean(x, axis=-1, keepdims=True)
    s2 = jnp.mean(x * x, axis=-1, keepdims=True)
    var = jnp.maximum(s2 - s1 * s1, 0.0)
    return (x - s1) * jax.lax.rsqrt(var + eps)


def _gelu(x):
    # tanh-approx GELU: lands on the EUP (its own bundle slot) instead of a
    # long erf polynomial on the VALU.  ~1e-3 relative deviation vs nn.GELU().
    return 0.5 * x * (1.0 + jnp.tanh(_SQRT_2_OVER_PI * (x + 0.044715 * x * x * x)))


def _mm(a, w):
    """bf16-operand matmul with f32 accumulation (weights are pre-cast)."""
    return jnp.dot(a.astype(MATMUL_DTYPE), w, preferred_element_type=jnp.float32)


def xtransformer_kernel(x_ref, w_in, b_in, w_attn, b_attn,
                        w1, b1, w2, b2, w_head, b_out, o_ref):
    x = x_ref[...]                                                  # (TB, F_IN_PAD) bf16

    # input_proj (zero-padded feature columns hit zero rows of w_in: exact)
    h = _mm(x, w_in[...]) + b_in[...]                               # (TB, DIM) f32

    # transformer blocks (depth unrolled; seq_len == 1, LN affine & W_v·W_o prefolded)
    for d in range(DEPTH):
        h = h + _mm(_norm(h), w_attn[d]) + b_attn[d]                # attention (folded)
        hid = _gelu(_mm(_norm(h), w1[d]) + b1[d])                   # FF up + GELU
        hid = hid.astype(MATMUL_DTYPE)                              # short-lived bf16 hidden
        h = h + _mm(hid, w2[d]) + b2[d]                             # FF down

    # output head: normalize, project to a lane-dense (8, TB) slab.
    # w_head is (8, DIM) with the real projection in row 0 (rows 1..7 zero);
    # storing all 8 rows keeps the output stores full-vreg / unmasked.
    hn = _norm(h).astype(MATMUL_DTYPE)                              # (TB, DIM)
    out8 = jax.lax.dot_general(
        w_head[...], hn,
        dimension_numbers=(((1,), (1,)), ((), ())),                 # A @ B^T
        preferred_element_type=jnp.float32)                         # (8, TB)
    o_ref[...] = out8 + b_out[0]


# ------------------------------ parameters --------------------------------

def init_params(key):
    """Deterministic synthetic parameters (shapes match the nn.Module).

    PyTorch Linear weights are (out, in); we store them pre-transposed to
    (in, out) so the math is plain x @ W."""
    ks = iter(jax.random.split(key, 64))

    def nrm(shape, scale):
        return (scale * jax.random.normal(next(ks), shape)).astype(jnp.float32)

    p = {"emb": {name: nrm((n, EMBED_DIM), 1.0)
                 for name, n in zip(CAT_NAMES, CAT_SIZES)}}

    p["w_in"] = nrm((F_IN, DIM), 1.0 / math.sqrt(F_IN))
    p["b_in"] = nrm((DIM,), 0.02)

    def stack(fn):
        return jnp.stack([fn() for _ in range(DEPTH)], axis=0)

    p["ln1g"] = stack(lambda: 1.0 + nrm((DIM,), 0.05))
    p["ln1b"] = stack(lambda: nrm((DIM,), 0.05))
    p["wqkv"] = stack(lambda: nrm((DIM, 3 * DIM), 1.0 / math.sqrt(DIM)))   # in_proj_weight.T
    p["bqkv"] = stack(lambda: nrm((3 * DIM,), 0.02))
    p["wo"] = stack(lambda: nrm((DIM, DIM), 1.0 / math.sqrt(DIM)))         # out_proj.weight.T
    p["bo"] = stack(lambda: nrm((DIM,), 0.02))
    p["ln2g"] = stack(lambda: 1.0 + nrm((DIM,), 0.05))
    p["ln2b"] = stack(lambda: nrm((DIM,), 0.05))
    p["w1"] = stack(lambda: nrm((DIM, 4 * DIM), 1.0 / math.sqrt(DIM)))
    p["b1"] = stack(lambda: nrm((4 * DIM,), 0.02))
    p["w2"] = stack(lambda: nrm((4 * DIM, DIM), 1.0 / math.sqrt(4 * DIM)))
    p["b2"] = stack(lambda: nrm((DIM,), 0.02))
    p["lnfg"] = 1.0 + nrm((DIM,), 0.05)
    p["lnfb"] = nrm((DIM,), 0.05)
    p["w_out"] = nrm((DIM, 1), 1.0 / math.sqrt(DIM))
    p["b_out"] = nrm((1,), 0.02)
    return p


def fold_params(p):
    """Fold seq_len==1 attention (W_v @ W_o) and all LayerNorm affines into the
    adjacent Linear layers (exact in f32); cast matmul weights to bf16."""
    out = {}
    w_in = jnp.zeros((F_IN_PAD, DIM), jnp.float32).at[:F_IN].set(p["w_in"])
    out["w_in"] = w_in.astype(MATMUL_DTYPE)                        # (F_IN_PAD, DIM)
    out["b_in"] = p["b_in"][None, :]                               # (1, DIM) f32

    w_attn, b_attn, w1, b1, w2, b2 = [], [], [], [], [], []
    for d in range(DEPTH):
        wv = p["wqkv"][d][:, 2 * DIM:]            # (DIM, DIM) value projection
        bv = p["bqkv"][d][2 * DIM:]               # (DIM,)
        w_vo = wv @ p["wo"][d]                    # (DIM, DIM)  W_v · W_o
        b_vo = bv @ p["wo"][d] + p["bo"][d]       # (DIM,)
        # fold norm1 affine: (norm(h)*g + b) @ W = norm(h) @ (g[:,None]*W) + b @ W
        g1, bt1 = p["ln1g"][d], p["ln1b"][d]
        w_attn.append(g1[:, None] * w_vo)
        b_attn.append(bt1 @ w_vo + b_vo)
        # fold norm2 affine into ff[0]
        g2, bt2 = p["ln2g"][d], p["ln2b"][d]
        w1.append(g2[:, None] * p["w1"][d])
        b1.append(bt2 @ p["w1"][d] + p["b1"][d])
        w2.append(p["w2"][d])
        b2.append(p["b2"][d])

    out["w_attn"] = jnp.stack(w_attn).astype(MATMUL_DTYPE)          # (DEPTH, DIM, DIM)
    out["b_attn"] = jnp.stack(b_attn)[:, None, :]                   # (DEPTH, 1, DIM) f32
    out["w1"] = jnp.stack(w1).astype(MATMUL_DTYPE)                  # (DEPTH, DIM, 4*DIM)
    out["b1"] = jnp.stack(b1)[:, None, :]                           # (DEPTH, 1, 4*DIM) f32
    out["w2"] = jnp.stack(w2).astype(MATMUL_DTYPE)                  # (DEPTH, 4*DIM, DIM)
    out["b2"] = jnp.stack(b2)[:, None, :]                           # (DEPTH, 1, DIM) f32

    # output head: fold lnf affine into the (dim -> 1) projection; store as an
    # (8, DIM) slab (row 0 real, rest zero) so both MXU operands are
    # sublane-aligned and the result is a full (8, TB) vreg slab.
    w_o = p["w_out"][:, 0]                                          # (DIM,)
    head_row = (p["lnfg"] * w_o)[None, :]                           # (1, DIM)
    out["w_head"] = jnp.concatenate(
        [head_row, jnp.zeros((7, DIM), jnp.float32)], axis=0
    ).astype(MATMUL_DTYPE)                                          # (8, DIM)
    out["b_out"] = (p["lnfb"] @ p["w_out"] + p["b_out"]).reshape(1)  # (1,) f32
    return out


# ------------------------------- wrapper -----------------------------------

def _choose_tb(batch):
    """Batch tile (rows).  Small batches: one tile (too little work to split).
    bp >= 256: at least 2 tiles with an even count so the 'parallel' grid axis
    splits evenly across v7x's two TensorCores; tb is 128-aligned because it is
    the lane dimension of the (8, tb) output block."""
    bp = _round_up(batch, 8)
    if bp < 256:
        return bp                                  # single grid step
    n = max(2, pl.cdiv(bp, MAX_TB))
    if n % 2:
        n += 1                                     # even tile count (megacore balance)
    return _round_up(pl.cdiv(bp, n), 128)


def forward(x_numeric, x_categorical, params):
    # --- glue (plain JAX): embedding lookups + feature concat, as in forward()
    embed_cat = jnp.concatenate(
        [params["emb"][k][x_categorical[k]] for k in CAT_NAMES], axis=-1)
    x = jnp.concatenate([x_numeric, embed_cat], axis=-1).astype(MATMUL_DTYPE)  # (B, F_IN)
    B = x.shape[0]

    tb = _choose_tb(B)
    bp = _round_up(B, tb)
    n_tiles = bp // tb
    # Zero padding: padded feature columns meet zero rows of w_in (exact);
    # padded batch rows stay finite through LayerNorm (eps floors the
    # variance) and are sliced off below.  Do NOT change the pad value to
    # NaN/inf and do not shrink eps without revisiting this.
    x = jnp.pad(x, ((0, bp - B), (0, F_IN_PAD - F_IN)))

    fp = fold_params(params)
    weights = [fp[k] for k in ("w_in", "b_in", "w_attn", "b_attn",
                               "w1", "b1", "w2", "b2", "w_head")]

    vmem_full = pl.BlockSpec(memory_space=pltpu.MemorySpace.VMEM)   # resident, untiled
    smem_full = pl.BlockSpec(memory_space=pltpu.MemorySpace.SMEM)   # scalar bias
    in_specs = ([pl.BlockSpec((tb, F_IN_PAD), lambda i: (i, 0))]    # activations, tiled
                + [vmem_full] * len(weights)
                + [smem_full])
    out_specs = pl.BlockSpec((8, tb), lambda i: (0, i))             # lane-dense output slab

    out_slab = pl.pallas_call(
        xtransformer_kernel,
        out_shape=jax.ShapeDtypeStruct((8, bp), jnp.float32),
        grid=(n_tiles,),
        in_specs=in_specs,
        out_specs=out_specs,
        compiler_params=pltpu.CompilerParams(
            dimension_semantics=("parallel",)),
    )(x, *weights, fp["b_out"])

    return out_slab[0, :B][:, None]                                 # (B, 1) f32


# ---------------------- pure-JAX f32 reference (for tol) -------------------

def reference_forward(x_numeric, x_categorical, p, eps=1e-5):
    def ln(x, g, b):
        mu = jnp.mean(x, -1, keepdims=True)
        var = jnp.mean((x - mu) ** 2, -1, keepdims=True)
        return (x - mu) * jax.lax.rsqrt(var + eps) * g + b

    def gelu_exact(x):
        return 0.5 * x * (1.0 + jax.lax.erf(x * _INV_SQRT2))

    embed_cat = jnp.concatenate(
        [p["emb"][k][x_categorical[k]] for k in CAT_NAMES], axis=-1)
    x = jnp.concatenate([x_numeric, embed_cat], axis=-1).astype(jnp.float32)
    h = x @ p["w_in"] + p["b_in"]
    for d in range(DEPTH):
        hn = ln(h, p["ln1g"][d], p["ln1b"][d])
        v = hn @ p["wqkv"][d][:, 2 * DIM:] + p["bqkv"][d][2 * DIM:]
        h = h + v @ p["wo"][d] + p["bo"][d]            # seq_len==1 => softmax==1
        hn = ln(h, p["ln2g"][d], p["ln2b"][d])
        hid = gelu_exact(hn @ p["w1"][d] + p["b1"][d])
        h = h + hid @ p["w2"][d] + p["b2"][d]
    hn = ln(h, p["lnfg"], p["lnfb"])
    return hn @ p["w_out"] + p["b_out"]


if __name__ == "__main__":
    key = jax.random.PRNGKey(0)
    kp, kn, kc = jax.random.split(key, 3)

    params = init_params(kp)

    B = 16
    x_numeric = jax.random.normal(kn, (B, NUM_NUMERIC), dtype=jnp.float32)
    ck = jax.random.split(kc, len(CAT_NAMES))
    x_categorical = {
        name: jax.random.randint(ck[i], (B,), 0, n, dtype=jnp.int32)
        for i, (name, n) in enumerate(zip(CAT_NAMES, CAT_SIZES))
    }

    out = jax.jit(forward)(x_numeric, x_categorical, params)
    out = jax.block_until_ready(out)
    assert out.shape == (B, 1) and out.dtype == jnp.float32
    assert bool(jnp.all(jnp.isfinite(out)))

    # Explicit tolerance vs. the f32 reference (covers bf16 matmuls, tanh-GELU
    # and the one-pass LayerNorm variance).
    ref = reference_forward(x_numeric, x_categorical, params)
    max_err = float(jnp.max(jnp.abs(out - ref)))
    tol = 5e-2 * float(jnp.max(jnp.abs(ref))) + 5e-2
    assert max_err < tol, f"max_err={max_err} tol={tol}"

    print("KERNEL_OK")
</pallas_src>

<mosaic_0001>
module attributes {stable_mosaic.version = 11 : i64} {
  func.func @xtransformer_kernel(%arg0: i32, %arg1: memref<16x128xbf16, #tpu.memory_space<vmem>>, %arg2: memref<128x64xbf16, #tpu.memory_space<vmem>>, %arg3: memref<1x64xf32, #tpu.memory_space<vmem>>, %arg4: memref<4x64x64xbf16, #tpu.memory_space<vmem>>, %arg5: memref<4x1x64xf32, #tpu.memory_space<vmem>>, %arg6: memref<4x64x256xbf16, #tpu.memory_space<vmem>>, %arg7: memref<4x1x256xf32, #tpu.memory_space<vmem>>, %arg8: memref<4x256x64xbf16, #tpu.memory_space<vmem>>, %arg9: memref<4x1x64xf32, #tpu.memory_space<vmem>>, %arg10: memref<8x64xbf16, #tpu.memory_space<vmem>>, %arg11: memref<1xf32, #tpu.memory_space<smem>>, %arg12: memref<8x16xf32, #tpu.memory_space<vmem>>) attributes {dimension_semantics = [#tpu.dimension_semantics<parallel>], iteration_bounds = array<i64: 1>, scalar_prefetch = 0 : i64, scratch_operands = 0 : i64, tpu.core_type = #tpu.core_type<tc>, window_params = [{transform_indices = @transform_0, window_bounds = array<i64: 16, 128>}, {pipeline_mode = #tpu.pipeline_mode<synchronous>, transform_indices = @transform_1, window_bounds = array<i64: 128, 64>}, {pipeline_mode = #tpu.pipeline_mode<synchronous>, transform_indices = @transform_2, window_bounds = array<i64: 1, 64>}, {pipeline_mode = #tpu.pipeline_mode<synchronous>, transform_indices = @transform_3, window_bounds = array<i64: 4, 64, 64>}, {pipeline_mode = #tpu.pipeline_mode<synchronous>, transform_indices = @transform_4, window_bounds = array<i64: 4, 1, 64>}, {pipeline_mode = #tpu.pipeline_mode<synchronous>, transform_indices = @transform_5, window_bounds = array<i64: 4, 64, 256>}, {pipeline_mode = #tpu.pipeline_mode<synchronous>, transform_indices = @transform_6, window_bounds = array<i64: 4, 1, 256>}, {pipeline_mode = #tpu.pipeline_mode<synchronous>, transform_indices = @transform_7, window_bounds = array<i64: 4, 256, 64>}, {pipeline_mode = #tpu.pipeline_mode<synchronous>, transform_indices = @transform_8, window_bounds = array<i64: 4, 1, 64>}, {pipeline_mode = #tpu.pipeline_mode<synchronous>, transform_indices = @transform_9, window_bounds = array<i64: 8, 64>}, {transform_indices = @transform_10, window_bounds = array<i64: 1>}, {transform_indices = @transform_11, window_bounds = array<i64: 8, 16>}]} {
    %c0 = arith.constant 0 : index
    %c0_0 = arith.constant 0 : index
    %0 = vector.load %arg1[%c0, %c0_0] : memref<16x128xbf16, #tpu.memory_space<vmem>>, vector<16x128xbf16>
    %c0_1 = arith.constant 0 : index
    %c0_2 = arith.constant 0 : index
    %1 = vector.load %arg2[%c0_1, %c0_2] : memref<128x64xbf16, #tpu.memory_space<vmem>>, vector<128x64xbf16>
    %cst = arith.constant dense<0.000000e+00> : vector<16x64xf32>
    %2 = tpu.matmul %0, %1, %cst {dimension_numbers = #tpu.dot_dimension_numbers<[1], [0], [0], [1], [0, 0, 1, 1], [], []>} : vector<16x128xbf16>, vector<128x64xbf16>, vector<16x64xf32> -> vector<16x64xf32>
    %c0_3 = arith.constant 0 : index
    %c0_4 = arith.constant 0 : index
    %3 = vector.load %arg3[%c0_3, %c0_4] : memref<1x64xf32, #tpu.memory_space<vmem>>, vector<1x64xf32>
    %4 = vector.broadcast %3 : vector<1x64xf32> to vector<16x64xf32>
    %5 = arith.addf %2, %4 : vector<16x64xf32>
    %cst_5 = arith.constant dense<0.000000e+00> : vector<16xf32>
    %6 = vector.multi_reduction <add>, %5, %cst_5 [1] : vector<16x64xf32> to vector<16xf32>
    %7 = vector.shape_cast %6 : vector<16xf32> to vector<16x1xf32>
    %cst_6 = arith.constant 6.400000e+01 : f32
    %8 = vector.broadcast %cst_6 : f32 to vector<16x1xf32>
    %9 = arith.divf %7, %8 : vector<16x1xf32>
    %10 = arith.mulf %5, %5 : vector<16x64xf32>
    %cst_7 = arith.constant dense<0.000000e+00> : vector<16xf32>
    %11 = vector.multi_reduction <add>, %10, %cst_7 [1] : vector<16x64xf32> to vector<16xf32>
    %12 = vector.shape_cast %11 : vector<16xf32> to vector<16x1xf32>
    %cst_8 = arith.constant 6.400000e+01 : f32
    %13 = vector.broadcast %cst_8 : f32 to vector<16x1xf32>
    %14 = arith.divf %12, %13 : vector<16x1xf32>
    %15 = arith.mulf %9, %9 : vector<16x1xf32>
    %16 = arith.subf %14, %15 : vector<16x1xf32>
    %cst_9 = arith.constant 0.000000e+00 : f32
    %17 = vector.broadcast %cst_9 : f32 to vector<16x1xf32>
    %18 = arith.maximumf %16, %17 : vector<16x1xf32>
    %19 = vector.broadcast %9 : vector<16x1xf32> to vector<16x64xf32>
    %20 = arith.subf %5, %19 : vector<16x64xf32>
    %cst_10 = arith.constant 9.99999974E-6 : f32
    %21 = vector.broadcast %cst_10 : f32 to vector<16x1xf32>
    %22 = arith.addf %18, %21 : vector<16x1xf32>
    %23 = math.rsqrt %22 : vector<16x1xf32>
    %24 = vector.broadcast %23 : vector<16x1xf32> to vector<16x64xf32>
    %25 = arith.mulf %20, %24 : vector<16x64xf32>
    %c0_11 = arith.constant 0 : index
    %c0_12 = arith.constant 0 : index
    %c0_13 = arith.constant 0 : index
    %26 = vector.load %arg4[%c0_11, %c0_12, %c0_13] : memref<4x64x64xbf16, #tpu.memory_space<vmem>>, vector<1x64x64xbf16>
    %27 = vector.shape_cast %26 : vector<1x64x64xbf16> to vector<64x64xbf16>
    %28 = arith.truncf %25 : vector<16x64xf32> to vector<16x64xbf16>
    %cst_14 = arith.constant dense<0.000000e+00> : vector<16x64xf32>
    %29 = tpu.matmul %28, %27, %cst_14 {dimension_numbers = #tpu.dot_dimension_numbers<[1], [0], [0], [1], [0, 0, 1, 1], [], []>} : vector<16x64xbf16>, vector<64x64xbf16>, vector<16x64xf32> -> vector<16x64xf32>
    %30 = arith.addf %5, %29 : vector<16x64xf32>
    %c0_15 = arith.constant 0 : index
    %c0_16 = arith.constant 0 : index
    %c0_17 = arith.constant 0 : index
    %31 = vector.load %arg5[%c0_15, %c0_16, %c0_17] : memref<4x1x64xf32, #tpu.memory_space<vmem>>, vector<1x1x64xf32>
    %32 = vector.shape_cast %31 : vector<1x1x64xf32> to vector<1x64xf32>
    %33 = vector.broadcast %32 : vector<1x64xf32> to vector<16x64xf32>
    %34 = arith.addf %30, %33 : vector<16x64xf32>
    %cst_18 = arith.constant dense<0.000000e+00> : vector<16xf32>
    %35 = vector.multi_reduction <add>, %34, %cst_18 [1] : vector<16x64xf32> to vector<16xf32>
    %36 = vector.shape_cast %35 : vector<16xf32> to vector<16x1xf32>
    %cst_19 = arith.constant 6.400000e+01 : f32
    %37 = vector.broadcast %cst_19 : f32 to vector<16x1xf32>
    %38 = arith.divf %36, %37 : vector<16x1xf32>
    %39 = arith.mulf %34, %34 : vector<16x64xf32>
    %cst_20 = arith.constant dense<0.000000e+00> : vector<16xf32>
    %40 = vector.multi_reduction <add>, %39, %cst_20 [1] : vector<16x64xf32> to vector<16xf32>
    %41 = vector.shape_cast %40 : vector<16xf32> to vector<16x1xf32>
    %cst_21 = arith.constant 6.400000e+01 : f32
    %42 = vector.broadcast %cst_21 : f32 to vector<16x1xf32>
    %43 = arith.divf %41, %42 : vector<16x1xf32>
    %44 = arith.mulf %38, %38 : vector<16x1xf32>
    %45 = arith.subf %43, %44 : vector<16x1xf32>
    %cst_22 = arith.constant 0.000000e+00 : f32
    %46 = vector.broadcast %cst_22 : f32 to vector<16x1xf32>
    %47 = arith.maximumf %45, %46 : vector<16x1xf32>
    %48 = vector.broadcast %38 : vector<16x1xf32> to vector<16x64xf32>
    %49 = arith.subf %34, %48 : vector<16x64xf32>
    %cst_23 = arith.constant 9.99999974E-6 : f32
    %50 = vector.broadcast %cst_23 : f32 to vector<16x1xf32>
    %51 = arith.addf %47, %50 : vector<16x1xf32>
    %52 = math.rsqrt %51 : vector<16x1xf32>
    %53 = vector.broadcast %52 : vector<16x1xf32> to vector<16x64xf32>
    %54 = arith.mulf %49, %53 : vector<16x64xf32>
    %c0_24 = arith.constant 0 : index
    %c0_25 = arith.constant 0 : index
    %c0_26 = arith.constant 0 : index
    %55 = vector.load %arg6[%c0_24, %c0_25, %c0_26] : memref<4x64x256xbf16, #tpu.memory_space<vmem>>, vector<1x64x256xbf16>
    %56 = vector.shape_cast %55 : vector<1x64x256xbf16> to vector<64x256xbf16>
    %57 = arith.truncf %54 : vector<16x64xf32> to vector<16x64xbf16>
    %cst_27 = arith.constant dense<0.000000e+00> : vector<16x256xf32>
    %58 = tpu.matmul %57, %56, %cst_27 {dimension_numbers = #tpu.dot_dimension_numbers<[1], [0], [0], [1], [0, 0, 1, 1], [], []>} : vector<16x64xbf16>, vector<64x256xbf16>, vector<16x256xf32> -> vector<16x256xf32>
    %c0_28 = arith.constant 0 : index
    %c0_29 = arith.constant 0 : index
    %c0_30 = arith.constant 0 : index
    %59 = vector.load %arg7[%c0_28, %c0_29, %c0_30] : memref<4x1x256xf32, #tpu.memory_space<vmem>>, vector<1x1x256xf32>
    %60 = vector.shape_cast %59 : vector<1x1x256xf32> to vector<1x256xf32>
    %61 = vector.broadcast %60 : vector<1x256xf32> to vector<16x256xf32>
    %62 = arith.addf %58, %61 : vector<16x256xf32>
    %cst_31 = arith.constant 5.000000e-01 : f32
    %63 = vector.broadcast %cst_31 : f32 to vector<16x256xf32>
    %64 = arith.mulf %63, %62 : vector<16x256xf32>
    %cst_32 = arith.constant 4.471500e-02 : f32
    %65 = vector.broadcast %cst_32 : f32 to vector<16x256xf32>
    %66 = arith.mulf %65, %62 : vector<16x256xf32>
    %67 = arith.mulf %66, %62 : vector<16x256xf32>
    %68 = arith.mulf %67, %62 : vector<16x256xf32>
    %69 = arith.addf %62, %68 : vector<16x256xf32>
    %cst_33 = arith.constant 0.797884583 : f32
    %70 = vector.broadcast %cst_33 : f32 to vector<16x256xf32>
    %71 = arith.mulf %70, %69 : vector<16x256xf32>
    %72 = math.tanh %71 : vector<16x256xf32>
    %cst_34 = arith.constant 1.000000e+00 : f32
    %73 = vector.broadcast %cst_34 : f32 to vector<16x256xf32>
    %74 = arith.addf %73, %72 : vector<16x256xf32>
    %75 = arith.mulf %64, %74 : vector<16x256xf32>
    %76 = arith.truncf %75 : vector<16x256xf32> to vector<16x256xbf16>
    %c0_35 = arith.constant 0 : index
    %c0_36 = arith.constant 0 : index
    %c0_37 = arith.constant 0 : index
    %77 = vector.load %arg8[%c0_35, %c0_36, %c0_37] : memref<4x256x64xbf16, #tpu.memory_space<vmem>>, vector<1x256x64xbf16>
    %78 = vector.shape_cast %77 : vector<1x256x64xbf16> to vector<256x64xbf16>
    %cst_38 = arith.constant dense<0.000000e+00> : vector<16x64xf32>
    %79 = tpu.matmul %76, %78, %cst_38 {dimension_numbers = #tpu.dot_dimension_numbers<[1], [0], [0], [1], [0, 0, 1, 1], [], []>} : vector<16x256xbf16>, vector<256x64xbf16>, vector<16x64xf32> -> vector<16x64xf32>
    %80 = arith.addf %34, %79 : vector<16x64xf32>
    %c0_39 = arith.constant 0 : index
    %c0_40 = arith.constant 0 : index
    %c0_41 = arith.constant 0 : index
    %81 = vector.load %arg9[%c0_39, %c0_40, %c0_41] : memref<4x1x64xf32, #tpu.memory_space<vmem>>, vector<1x1x64xf32>
    %82 = vector.shape_cast %81 : vector<1x1x64xf32> to vector<1x64xf32>
    %83 = vector.broadcast %82 : vector<1x64xf32> to vector<16x64xf32>
    %84 = arith.addf %80, %83 : vector<16x64xf32>
    %cst_42 = arith.constant dense<0.000000e+00> : vector<16xf32>
    %85 = vector.multi_reduction <add>, %84, %cst_42 [1] : vector<16x64xf32> to vector<16xf32>
    %86 = vector.shape_cast %85 : vector<16xf32> to vector<16x1xf32>
    %cst_43 = arith.constant 6.400000e+01 : f32
    %87 = vector.broadcast %cst_43 : f32 to vector<16x1xf32>
    %88 = arith.divf %86, %87 : vector<16x1xf32>
    %89 = arith.mulf %84, %84 : vector<16x64xf32>
    %cst_44 = arith.constant dense<0.000000e+00> : vector<16xf32>
    %90 = vector.multi_reduction <add>, %89, %cst_44 [1] : vector<16x64xf32> to vector<16xf32>
    %91 = vector.shape_cast %90 : vector<16xf32> to vector<16x1xf32>
    %cst_45 = arith.constant 6.400000e+01 : f32
    %92 = vector.broadcast %cst_45 : f32 to vector<16x1xf32>
    %93 = arith.divf %91, %92 : vector<16x1xf32>
    %94 = arith.mulf %88, %88 : vector<16x1xf32>
    %95 = arith.subf %93, %94 : vector<16x1xf32>
    %cst_46 = arith.constant 0.000000e+00 : f32
    %96 = vector.broadcast %cst_46 : f32 to vector<16x1xf32>
    %97 = arith.maximumf %95, %96 : vector<16x1xf32>
    %98 = vector.broadcast %88 : vector<16x1xf32> to vector<16x64xf32>
    %99 = arith.subf %84, %98 : vector<16x64xf32>
    %cst_47 = arith.constant 9.99999974E-6 : f32
    %100 = vector.broadcast %cst_47 : f32 to vector<16x1xf32>
    %101 = arith.addf %97, %100 : vector<16x1xf32>
    %102 = math.rsqrt %101 : vector<16x1xf32>
    %103 = vector.broadcast %102 : vector<16x1xf32> to vector<16x64xf32>
    %104 = arith.mulf %99, %103 : vector<16x64xf32>
    %c1 = arith.constant 1 : index
    %c0_48 = arith.constant 0 : index
    %c0_49 = arith.constant 0 : index
    %105 = vector.load %arg4[%c1, %c0_48, %c0_49] : memref<4x64x64xbf16, #tpu.memory_space<vmem>>, vector<1x64x64xbf16>
    %106 = vector.shape_cast %105 : vector<1x64x64xbf16> to vector<64x64xbf16>
    %107 = arith.truncf %104 : vector<16x64xf32> to vector<16x64xbf16>
    %cst_50 = arith.constant dense<0.000000e+00> : vector<16x64xf32>
    %108 = tpu.matmul %107, %106, %cst_50 {dimension_numbers = #tpu.dot_dimension_numbers<[1], [0], [0], [1], [0, 0, 1, 1], [], []>} : vector<16x64xbf16>, vector<64x64xbf16>, vector<16x64xf32> -> vector<16x64xf32>
    %109 = arith.addf %84, %108 : vector<16x64xf32>
    %c1_51 = arith.constant 1 : index
    %c0_52 = arith.constant 0 : index
    %c0_53 = arith.constant 0 : index
    %110 = vector.load %arg5[%c1_51, %c0_52, %c0_53] : memref<4x1x64xf32, #tpu.memory_space<vmem>>, vector<1x1x64xf32>
    %111 = vector.shape_cast %110 : vector<1x1x64xf32> to vector<1x64xf32>
    %112 = vector.broadcast %111 : vector<1x64xf32> to vector<16x64xf32>
    %113 = arith.addf %109, %112 : vector<16x64xf32>
    %cst_54 = arith.constant dense<0.000000e+00> : vector<16xf32>
    %114 = vector.multi_reduction <add>, %113, %cst_54 [1] : vector<16x64xf32> to vector<16xf32>
    %115 = vector.shape_cast %114 : vector<16xf32> to vector<16x1xf32>
    %cst_55 = arith.constant 6.400000e+01 : f32
    %116 = vector.broadcast %cst_55 : f32 to vector<16x1xf32>
    %117 = arith.divf %115, %116 : vector<16x1xf32>
    %118 = arith.mulf %113, %113 : vector<16x64xf32>
    %cst_56 = arith.constant dense<0.000000e+00> : vector<16xf32>
    %119 = vector.multi_reduction <add>, %118, %cst_56 [1] : vector<16x64xf32> to vector<16xf32>
    %120 = vector.shape_cast %119 : vector<16xf32> to vector<16x1xf32>
    %cst_57 = arith.constant 6.400000e+01 : f32
    %121 = vector.broadcast %cst_57 : f32 to vector<16x1xf32>
    %122 = arith.divf %120, %121 : vector<16x1xf32>
    %123 = arith.mulf %117, %117 : vector<16x1xf32>
    %124 = arith.subf %122, %123 : vector<16x1xf32>
    %cst_58 = arith.constant 0.000000e+00 : f32
    %125 = vector.broadcast %cst_58 : f32 to vector<16x1xf32>
    %126 = arith.maximumf %124, %125 : vector<16x1xf32>
    %127 = vector.broadcast %117 : vector<16x1xf32> to vector<16x64xf32>
    %128 = arith.subf %113, %127 : vector<16x64xf32>
    %cst_59 = arith.constant 9.99999974E-6 : f32
    %129 = vector.broadcast %cst_59 : f32 to vector<16x1xf32>
    %130 = arith.addf %126, %129 : vector<16x1xf32>
    %131 = math.rsqrt %130 : vector<16x1xf32>
    %132 = vector.broadcast %131 : vector<16x1xf32> to vector<16x64xf32>
    %133 = arith.mulf %128, %132 : vector<16x64xf32>
    %c1_60 = arith.constant 1 : index
    %c0_61 = arith.constant 0 : index
    %c0_62 = arith.constant 0 : index
    %134 = vector.load %arg6[%c1_60, %c0_61, %c0_62] : memref<4x64x256xbf16, #tpu.memory_space<vmem>>, vector<1x64x256xbf16>
    %135 = vector.shape_cast %134 : vector<1x64x256xbf16> to vector<64x256xbf16>
    %136 = arith.truncf %133 : vector<16x64xf32> to vector<16x64xbf16>
    %cst_63 = arith.constant dense<0.000000e+00> : vector<16x256xf32>
    %137 = tpu.matmul %136, %135, %cst_63 {dimension_numbers = #tpu.dot_dimension_numbers<[1], [0], [0], [1], [0, 0, 1, 1], [], []>} : vector<16x64xbf16>, vector<64x256xbf16>, vector<16x256xf32> -> vector<16x256xf32>
    %c1_64 = arith.constant 1 : index
    %c0_65 = arith.constant 0 : index
    %c0_66 = arith.constant 0 : index
    %138 = vector.load %arg7[%c1_64, %c0_65, %c0_66] : memref<4x1x256xf32, #tpu.memory_space<vmem>>, vector<1x1x256xf32>
    %139 = vector.shape_cast %138 : vector<1x1x256xf32> to vector<1x256xf32>
    %140 = vector.broadcast %139 : vector<1x256xf32> to vector<16x256xf32>
    %141 = arith.addf %137, %140 : vector<16x256xf32>
    %cst_67 = arith.constant 5.000000e-01 : f32
    %142 = vector.broadcast %cst_67 : f32 to vector<16x256xf32>
    %143 = arith.mulf %142, %141 : vector<16x256xf32>
    %cst_68 = arith.constant 4.471500e-02 : f32
    %144 = vector.broadcast %cst_68 : f32 to vector<16x256xf32>
    %145 = arith.mulf %144, %141 : vector<16x256xf32>
    %146 = arith.mulf %145, %141 : vector<16x256xf32>
    %147 = arith.mulf %146, %141 : vector<16x256xf32>
    %148 = arith.addf %141, %147 : vector<16x256xf32>
    %cst_69 = arith.constant 0.797884583 : f32
    %149 = vector.broadcast %cst_69 : f32 to vector<16x256xf32>
    %150 = arith.mulf %149, %148 : vector<16x256xf32>
    %151 = math.tanh %150 : vector<16x256xf32>
    %cst_70 = arith.constant 1.000000e+00 : f32
    %152 = vector.broadcast %cst_70 : f32 to vector<16x256xf32>
    %153 = arith.addf %152, %151 : vector<16x256xf32>
    %154 = arith.mulf %143, %153 : vector<16x256xf32>
    %155 = arith.truncf %154 : vector<16x256xf32> to vector<16x256xbf16>
    %c1_71 = arith.constant 1 : index
    %c0_72 = arith.constant 0 : index
    %c0_73 = arith.constant 0 : index
    %156 = vector.load %arg8[%c1_71, %c0_72, %c0_73] : memref<4x256x64xbf16, #tpu.memory_space<vmem>>, vector<1x256x64xbf16>
    %157 = vector.shape_cast %156 : vector<1x256x64xbf16> to vector<256x64xbf16>
    %cst_74 = arith.constant dense<0.000000e+00> : vector<16x64xf32>
    %158 = tpu.matmul %155, %157, %cst_74 {dimension_numbers = #tpu.dot_dimension_numbers<[1], [0], [0], [1], [0, 0, 1, 1], [], []>} : vector<16x256xbf16>, vector<256x64xbf16>, vector<16x64xf32> -> vector<16x64xf32>
    %159 = arith.addf %113, %158 : vector<16x64xf32>
    %c1_75 = arith.constant 1 : index
    %c0_76 = arith.constant 0 : index
    %c0_77 = arith.constant 0 : index
    %160 = vector.load %arg9[%c1_75, %c0_76, %c0_77] : memref<4x1x64xf32, #tpu.memory_space<vmem>>, vector<1x1x64xf32>
    %161 = vector.shape_cast %160 : vector<1x1x64xf32> to vector<1x64xf32>
    %162 = vector.broadcast %161 : vector<1x64xf32> to vector<16x64xf32>
    %163 = arith.addf %159, %162 : vector<16x64xf32>
    %cst_78 = arith.constant dense<0.000000e+00> : vector<16xf32>
    %164 = vector.multi_reduction <add>, %163, %cst_78 [1] : vector<16x64xf32> to vector<16xf32>
    %165 = vector.shape_cast %164 : vector<16xf32> to vector<16x1xf32>
    %cst_79 = arith.constant 6.400000e+01 : f32
    %166 = vector.broadcast %cst_79 : f32 to vector<16x1xf32>
    %167 = arith.divf %165, %166 : vector<16x1xf32>
    %168 = arith.mulf %163, %163 : vector<16x64xf32>
    %cst_80 = arith.constant dense<0.000000e+00> : vector<16xf32>
    %169 = vector.multi_reduction <add>, %168, %cst_80 [1] : vector<16x64xf32> to vector<16xf32>
    %170 = vector.shape_cast %169 : vector<16xf32> to vector<16x1xf32>
    %cst_81 = arith.constant 6.400000e+01 : f32
    %171 = vector.broadcast %cst_81 : f32 to vector<16x1xf32>
    %172 = arith.divf %170, %171 : vector<16x1xf32>
    %173 = arith.mulf %167, %167 : vector<16x1xf32>
    %174 = arith.subf %172, %173 : vector<16x1xf32>
    %cst_82 = arith.constant 0.000000e+00 : f32
    %175 = vector.broadcast %cst_82 : f32 to vector<16x1xf32>
    %176 = arith.maximumf %174, %175 : vector<16x1xf32>
    %177 = vector.broadcast %167 : vector<16x1xf32> to vector<16x64xf32>
    %178 = arith.subf %163, %177 : vector<16x64xf32>
    %cst_83 = arith.constant 9.99999974E-6 : f32
    %179 = vector.broadcast %cst_83 : f32 to vector<16x1xf32>
    %180 = arith.addf %176, %179 : vector<16x1xf32>
    %181 = math.rsqrt %180 : vector<16x1xf32>
    %182 = vector.broadcast %181 : vector<16x1xf32> to vector<16x64xf32>
    %183 = arith.mulf %178, %182 : vector<16x64xf32>
    %c2 = arith.constant 2 : index
    %c0_84 = arith.constant 0 : index
    %c0_85 = arith.constant 0 : index
    %184 = vector.load %arg4[%c2, %c0_84, %c0_85] : memref<4x64x64xbf16, #tpu.memory_space<vmem>>, vector<1x64x64xbf16>
    %185 = vector.shape_cast %184 : vector<1x64x64xbf16> to vector<64x64xbf16>
    %186 = arith.truncf %183 : vector<16x64xf32> to vector<16x64xbf16>
    %cst_86 = arith.constant dense<0.000000e+00> : vector<16x64xf32>
    %187 = tpu.matmul %186, %185, %cst_86 {dimension_numbers = #tpu.dot_dimension_numbers<[1], [0], [0], [1], [0, 0, 1, 1], [], []>} : vector<16x64xbf16>, vector<64x64xbf16>, vector<16x64xf32> -> vector<16x64xf32>
    %188 = arith.addf %163, %187 : vector<16x64xf32>
    %c2_87 = arith.constant 2 : index
    %c0_88 = arith.constant 0 : index
    %c0_89 = arith.constant 0 : index
    %189 = vector.load %arg5[%c2_87, %c0_88, %c0_89] : memref<4x1x64xf32, #tpu.memory_space<vmem>>, vector<1x1x64xf32>
    %190 = vector.shape_cast %189 : vector<1x1x64xf32> to vector<1x64xf32>
    %191 = vector.broadcast %190 : vector<1x64xf32> to vector<16x64xf32>
    %192 = arith.addf %188, %191 : vector<16x64xf32>
    %cst_90 = arith.constant dense<0.000000e+00> : vector<16xf32>
    %193 = vector.multi_reduction <add>, %192, %cst_90 [1] : vector<16x64xf32> to vector<16xf32>
    %194 = vector.shape_cast %193 : vector<16xf32> to vector<16x1xf32>
    %cst_91 = arith.constant 6.400000e+01 : f32
    %195 = vector.broadcast %cst_91 : f32 to vector<16x1xf32>
    %196 = arith.divf %194, %195 : vector<16x1xf32>
    %197 = arith.mulf %192, %192 : vector<16x64xf32>
    %cst_92 = arith.constant dense<0.000000e+00> : vector<16xf32>
    %198 = vector.multi_reduction <add>, %197, %cst_92 [1] : vector<16x64xf32> to vector<16xf32>
    %199 = vector.shape_cast %198 : vector<16xf32> to vector<16x1xf32>
    %cst_93 = arith.constant 6.400000e+01 : f32
    %200 = vector.broadcast %cst_93 : f32 to vector<16x1xf32>
    %201 = arith.divf %199, %200 : vector<16x1xf32>
    %202 = arith.mulf %196, %196 : vector<16x1xf32>
    %203 = arith.subf %201, %202 : vector<16x1xf32>
    %cst_94 = arith.constant 0.000000e+00 : f32
    %204 = vector.broadcast %cst_94 : f32 to vector<16x1xf32>
    %205 = arith.maximumf %203, %204 : vector<16x1xf32>
    %206 = vector.broadcast %196 : vector<16x1xf32> to vector<16x64xf32>
    %207 = arith.subf %192, %206 : vector<16x64xf32>
    %cst_95 = arith.constant 9.99999974E-6 : f32
    %208 = vector.broadcast %cst_95 : f32 to vector<16x1xf32>
    %209 = arith.addf %205, %208 : vector<16x1xf32>
    %210 = math.rsqrt %209 : vector<16x1xf32>
    %211 = vector.broadcast %210 : vector<16x1xf32> to vector<16x64xf32>
    %212 = arith.mulf %207, %211 : vector<16x64xf32>
    %c2_96 = arith.constant 2 : index
    %c0_97 = arith.constant 0 : index
    %c0_98 = arith.constant 0 : index
    %213 = vector.load %arg6[%c2_96, %c0_97, %c0_98] : memref<4x64x256xbf16, #tpu.memory_space<vmem>>, vector<1x64x256xbf16>
    %214 = vector.shape_cast %213 : vector<1x64x256xbf16> to vector<64x256xbf16>
    %215 = arith.truncf %212 : vector<16x64xf32> to vector<16x64xbf16>
    %cst_99 = arith.constant dense<0.000000e+00> : vector<16x256xf32>
    %216 = tpu.matmul %215, %214, %cst_99 {dimension_numbers = #tpu.dot_dimension_numbers<[1], [0], [0], [1], [0, 0, 1, 1], [], []>} : vector<16x64xbf16>, vector<64x256xbf16>, vector<16x256xf32> -> vector<16x256xf32>
    %c2_100 = arith.constant 2 : index
    %c0_101 = arith.constant 0 : index
    %c0_102 = arith.constant 0 : index
    %217 = vector.load %arg7[%c2_100, %c0_101, %c0_102] : memref<4x1x256xf32, #tpu.memory_space<vmem>>, vector<1x1x256xf32>
    %218 = vector.shape_cast %217 : vector<1x1x256xf32> to vector<1x256xf32>
    %219 = vector.broadcast %218 : vector<1x256xf32> to vector<16x256xf32>
    %220 = arith.addf %216, %219 : vector<16x256xf32>
    %cst_103 = arith.constant 5.000000e-01 : f32
    %221 = vector.broadcast %cst_103 : f32 to vector<16x256xf32>
    %222 = arith.mulf %221, %220 : vector<16x256xf32>
    %cst_104 = arith.constant 4.471500e-02 : f32
    %223 = vector.broadcast %cst_104 : f32 to vector<16x256xf32>
    %224 = arith.mulf %223, %220 : vector<16x256xf32>
    %225 = arith.mulf %224, %220 : vector<16x256xf32>
    %226 = arith.mulf %225, %220 : vector<16x256xf32>
    %227 = arith.addf %220, %226 : vector<16x256xf32>
    %cst_105 = arith.constant 0.797884583 : f32
    %228 = vector.broadcast %cst_105 : f32 to vector<16x256xf32>
    %229 = arith.mulf %228, %227 : vector<16x256xf32>
    %230 = math.tanh %229 : vector<16x256xf32>
    %cst_106 = arith.constant 1.000000e+00 : f32
    %231 = vector.broadcast %cst_106 : f32 to vector<16x256xf32>
    %232 = arith.addf %231, %230 : vector<16x256xf32>
    %233 = arith.mulf %222, %232 : vector<16x256xf32>
    %234 = arith.truncf %233 : vector<16x256xf32> to vector<16x256xbf16>
    %c2_107 = arith.constant 2 : index
    %c0_108 = arith.constant 0 : index
    %c0_109 = arith.constant 0 : index
    %235 = vector.load %arg8[%c2_107, %c0_108, %c0_109] : memref<4x256x64xbf16, #tpu.memory_space<vmem>>, vector<1x256x64xbf16>
    %236 = vector.shape_cast %235 : vector<1x256x64xbf16> to vector<256x64xbf16>
    %cst_110 = arith.constant dense<0.000000e+00> : vector<16x64xf32>
    %237 = tpu.matmul %234, %236, %cst_110 {dimension_numbers = #tpu.dot_dimension_numbers<[1], [0], [0], [1], [0, 0, 1, 1], [], []>} : vector<16x256xbf16>, vector<256x64xbf16>, vector<16x64xf32> -> vector<16x64xf32>
    %238 = arith.addf %192, %237 : vector<16x64xf32>
    %c2_111 = arith.constant 2 : index
    %c0_112 = arith.constant 0 : index
    %c0_113 = arith.constant 0 : index
    %239 = vector.load %arg9[%c2_111, %c0_112, %c0_113] : memref<4x1x64xf32, #tpu.memory_space<vmem>>, vector<1x1x64xf32>
    %240 = vector.shape_cast %239 : vector<1x1x64xf32> to vector<1x64xf32>
    %241 = vector.broadcast %240 : vector<1x64xf32> to vector<16x64xf32>
    %242 = arith.addf %238, %241 : vector<16x64xf32>
    %cst_114 = arith.constant dense<0.000000e+00> : vector<16xf32>
    %243 = vector.multi_reduction <add>, %242, %cst_114 [1] : vector<16x64xf32> to vector<16xf32>
    %244 = vector.shape_cast %243 : vector<16xf32> to vector<16x1xf32>
    %cst_115 = arith.constant 6.400000e+01 : f32
    %245 = vector.broadcast %cst_115 : f32 to vector<16x1xf32>
    %246 = arith.divf %244, %245 : vector<16x1xf32>
    %247 = arith.mulf %242, %242 : vector<16x64xf32>
    %cst_116 = arith.constant dense<0.000000e+00> : vector<16xf32>
    %248 = vector.multi_reduction <add>, %247, %cst_116 [1] : vector<16x64xf32> to vector<16xf32>
    %249 = vector.shape_cast %248 : vector<16xf32> to vector<16x1xf32>
    %cst_117 = arith.constant 6.400000e+01 : f32
    %250 = vector.broadcast %cst_117 : f32 to vector<16x1xf32>
    %251 = arith.divf %249, %250 : vector<16x1xf32>
    %252 = arith.mulf %246, %246 : vector<16x1xf32>
    %253 = arith.subf %251, %252 : vector<16x1xf32>
    %cst_118 = arith.constant 0.000000e+00 : f32
    %254 = vector.broadcast %cst_118 : f32 to vector<16x1xf32>
    %255 = arith.maximumf %253, %254 : vector<16x1xf32>
    %256 = vector.broadcast %246 : vector<16x1xf32> to vector<16x64xf32>
    %257 = arith.subf %242, %256 : vector<16x64xf32>
    %cst_119 = arith.constant 9.99999974E-6 : f32
    %258 = vector.broadcast %cst_119 : f32 to vector<16x1xf32>
    %259 = arith.addf %255, %258 : vector<16x1xf32>
    %260 = math.rsqrt %259 : vector<16x1xf32>
    %261 = vector.broadcast %260 : vector<16x1xf32> to vector<16x64xf32>
    %262 = arith.mulf %257, %261 : vector<16x64xf32>
    %c3 = arith.constant 3 : index
    %c0_120 = arith.constant 0 : index
    %c0_121 = arith.constant 0 : index
    %263 = vector.load %arg4[%c3, %c0_120, %c0_121] : memref<4x64x64xbf16, #tpu.memory_space<vmem>>, vector<1x64x64xbf16>
    %264 = vector.shape_cast %263 : vector<1x64x64xbf16> to vector<64x64xbf16>
    %265 = arith.truncf %262 : vector<16x64xf32> to vector<16x64xbf16>
    %cst_122 = arith.constant dense<0.000000e+00> : vector<16x64xf32>
    %266 = tpu.matmul %265, %264, %cst_122 {dimension_numbers = #tpu.dot_dimension_numbers<[1], [0], [0], [1], [0, 0, 1, 1], [], []>} : vector<16x64xbf16>, vector<64x64xbf16>, vector<16x64xf32> -> vector<16x64xf32>
    %267 = arith.addf %242, %266 : vector<16x64xf32>
    %c3_123 = arith.constant 3 : index
    %c0_124 = arith.constant 0 : index
    %c0_125 = arith.constant 0 : index
    %268 = vector.load %arg5[%c3_123, %c0_124, %c0_125] : memref<4x1x64xf32, #tpu.memory_space<vmem>>, vector<1x1x64xf32>
    %269 = vector.shape_cast %268 : vector<1x1x64xf32> to vector<1x64xf32>
    %270 = vector.broadcast %269 : vector<1x64xf32> to vector<16x64xf32>
    %271 = arith.addf %267, %270 : vector<16x64xf32>
    %cst_126 = arith.constant dense<0.000000e+00> : vector<16xf32>
    %272 = vector.multi_reduction <add>, %271, %cst_126 [1] : vector<16x64xf32> to vector<16xf32>
    %273 = vector.shape_cast %272 : vector<16xf32> to vector<16x1xf32>
    %cst_127 = arith.constant 6.400000e+01 : f32
    %274 = vector.broadcast %cst_127 : f32 to vector<16x1xf32>
    %275 = arith.divf %273, %274 : vector<16x1xf32>
    %276 = arith.mulf %271, %271 : vector<16x64xf32>
    %cst_128 = arith.constant dense<0.000000e+00> : vector<16xf32>
    %277 = vector.multi_reduction <add>, %276, %cst_128 [1] : vector<16x64xf32> to vector<16xf32>
    %278 = vector.shape_cast %277 : vector<16xf32> to vector<16x1xf32>
    %cst_129 = arith.constant 6.400000e+01 : f32
    %279 = vector.broadcast %cst_129 : f32 to vector<16x1xf32>
    %280 = arith.divf %278, %279 : vector<16x1xf32>
    %281 = arith.mulf %275, %275 : vector<16x1xf32>
    %282 = arith.subf %280, %281 : vector<16x1xf32>
    %cst_130 = arith.constant 0.000000e+00 : f32
    %283 = vector.broadcast %cst_130 : f32 to vector<16x1xf32>
    %284 = arith.maximumf %282, %283 : vector<16x1xf32>
    %285 = vector.broadcast %275 : vector<16x1xf32> to vector<16x64xf32>
    %286 = arith.subf %271, %285 : vector<16x64xf32>
    %cst_131 = arith.constant 9.99999974E-6 : f32
    %287 = vector.broadcast %cst_131 : f32 to vector<16x1xf32>
    %288 = arith.addf %284, %287 : vector<16x1xf32>
    %289 = math.rsqrt %288 : vector<16x1xf32>
    %290 = vector.broadcast %289 : vector<16x1xf32> to vector<16x64xf32>
    %291 = arith.mulf %286, %290 : vector<16x64xf32>
    %c3_132 = arith.constant 3 : index
    %c0_133 = arith.constant 0 : index
    %c0_134 = arith.constant 0 : index
    %292 = vector.load %arg6[%c3_132, %c0_133, %c0_134] : memref<4x64x256xbf16, #tpu.memory_space<vmem>>, vector<1x64x256xbf16>
    %293 = vector.shape_cast %292 : vector<1x64x256xbf16> to vector<64x256xbf16>
    %294 = arith.truncf %291 : vector<16x64xf32> to vector<16x64xbf16>
    %cst_135 = arith.constant dense<0.000000e+00> : vector<16x256xf32>
    %295 = tpu.matmul %294, %293, %cst_135 {dimension_numbers = #tpu.dot_dimension_numbers<[1], [0], [0], [1], [0, 0, 1, 1], [], []>} : vector<16x64xbf16>, vector<64x256xbf16>, vector<16x256xf32> -> vector<16x256xf32>
    %c3_136 = arith.constant 3 : index
    %c0_137 = arith.constant 0 : index
    %c0_138 = arith.constant 0 : index
    %296 = vector.load %arg7[%c3_136, %c0_137, %c0_138] : memref<4x1x256xf32, #tpu.memory_space<vmem>>, vector<1x1x256xf32>
    %297 = vector.shape_cast %296 : vector<1x1x256xf32> to vector<1x256xf32>
    %298 = vector.broadcast %297 : vector<1x256xf32> to vector<16x256xf32>
    %299 = arith.addf %295, %298 : vector<16x256xf32>
    %cst_139 = arith.constant 5.000000e-01 : f32
    %300 = vector.broadcast %cst_139 : f32 to vector<16x256xf32>
    %301 = arith.mulf %300, %299 : vector<16x256xf32>
    %cst_140 = arith.constant 4.471500e-02 : f32
    %302 = vector.broadcast %cst_140 : f32 to vector<16x256xf32>
    %303 = arith.mulf %302, %299 : vector<16x256xf32>
    %304 = arith.mulf %303, %299 : vector<16x256xf32>
    %305 = arith.mulf %304, %299 : vector<16x256xf32>
    %306 = arith.addf %299, %305 : vector<16x256xf32>
    %cst_141 = arith.constant 0.797884583 : f32
    %307 = vector.broadcast %cst_141 : f32 to vector<16x256xf32>
    %308 = arith.mulf %307, %306 : vector<16x256xf32>
    %309 = math.tanh %308 : vector<16x256xf32>
    %cst_142 = arith.constant 1.000000e+00 : f32
    %310 = vector.broadcast %cst_142 : f32 to vector<16x256xf32>
    %311 = arith.addf %310, %309 : vector<16x256xf32>
    %312 = arith.mulf %301, %311 : vector<16x256xf32>
    %313 = arith.truncf %312 : vector<16x256xf32> to vector<16x256xbf16>
    %c3_143 = arith.constant 3 : index
    %c0_144 = arith.constant 0 : index
    %c0_145 = arith.constant 0 : index
    %314 = vector.load %arg8[%c3_143, %c0_144, %c0_145] : memref<4x256x64xbf16, #tpu.memory_space<vmem>>, vector<1x256x64xbf16>
    %315 = vector.shape_cast %314 : vector<1x256x64xbf16> to vector<256x64xbf16>
    %cst_146 = arith.constant dense<0.000000e+00> : vector<16x64xf32>
    %316 = tpu.matmul %313, %315, %cst_146 {dimension_numbers = #tpu.dot_dimension_numbers<[1], [0], [0], [1], [0, 0, 1, 1], [], []>} : vector<16x256xbf16>, vector<256x64xbf16>, vector<16x64xf32> -> vector<16x64xf32>
    %317 = arith.addf %271, %316 : vector<16x64xf32>
    %c3_147 = arith.constant 3 : index
    %c0_148 = arith.constant 0 : index
    %c0_149 = arith.constant 0 : index
    %318 = vector.load %arg9[%c3_147, %c0_148, %c0_149] : memref<4x1x64xf32, #tpu.memory_space<vmem>>, vector<1x1x64xf32>
    %319 = vector.shape_cast %318 : vector<1x1x64xf32> to vector<1x64xf32>
    %320 = vector.broadcast %319 : vector<1x64xf32> to vector<16x64xf32>
    %321 = arith.addf %317, %320 : vector<16x64xf32>
    %cst_150 = arith.constant dense<0.000000e+00> : vector<16xf32>
    %322 = vector.multi_reduction <add>, %321, %cst_150 [1] : vector<16x64xf32> to vector<16xf32>
    %323 = vector.shape_cast %322 : vector<16xf32> to vector<16x1xf32>
    %cst_151 = arith.constant 6.400000e+01 : f32
    %324 = vector.broadcast %cst_151 : f32 to vector<16x1xf32>
    %325 = arith.divf %323, %324 : vector<16x1xf32>
    %326 = arith.mulf %321, %321 : vector<16x64xf32>
    %cst_152 = arith.constant dense<0.000000e+00> : vector<16xf32>
    %327 = vector.multi_reduction <add>, %326, %cst_152 [1] : vector<16x64xf32> to vector<16xf32>
    %328 = vector.shape_cast %327 : vector<16xf32> to vector<16x1xf32>
    %cst_153 = arith.constant 6.400000e+01 : f32
    %329 = vector.broadcast %cst_153 : f32 to vector<16x1xf32>
    %330 = arith.divf %328, %329 : vector<16x1xf32>
    %331 = arith.mulf %325, %325 : vector<16x1xf32>
    %332 = arith.subf %330, %331 : vector<16x1xf32>
    %cst_154 = arith.constant 0.000000e+00 : f32
    %333 = vector.broadcast %cst_154 : f32 to vector<16x1xf32>
    %334 = arith.maximumf %332, %333 : vector<16x1xf32>
    %335 = vector.broadcast %325 : vector<16x1xf32> to vector<16x64xf32>
    %336 = arith.subf %321, %335 : vector<16x64xf32>
    %cst_155 = arith.constant 9.99999974E-6 : f32
    %337 = vector.broadcast %cst_155 : f32 to vector<16x1xf32>
    %338 = arith.addf %334, %337 : vector<16x1xf32>
    %339 = math.rsqrt %338 : vector<16x1xf32>
    %340 = vector.broadcast %339 : vector<16x1xf32> to vector<16x64xf32>
    %341 = arith.mulf %336, %340 : vector<16x64xf32>
    %342 = arith.truncf %341 : vector<16x64xf32> to vector<16x64xbf16>
    %c0_156 = arith.constant 0 : index
    %c0_157 = arith.constant 0 : index
    %343 = vector.load %arg10[%c0_156, %c0_157] : memref<8x64xbf16, #tpu.memory_space<vmem>>, vector<8x64xbf16>
    %cst_158 = arith.constant dense<0.000000e+00> : vector<8x16xf32>
    %344 = tpu.matmul %343, %342, %cst_158 {dimension_numbers = #tpu.dot_dimension_numbers<[1], [1], [0], [0], [0, 0, 1, 0], [], []>} : vector<8x64xbf16>, vector<16x64xbf16>, vector<8x16xf32> -> vector<8x16xf32>
    %c0_159 = arith.constant 0 : index
    %345 = memref.load %arg11[%c0_159] : memref<1xf32, #tpu.memory_space<smem>>
    %346 = vector.broadcast %345 : f32 to vector<8x16xf32>
    %347 = arith.addf %344, %346 : vector<8x16xf32>
    %c0_160 = arith.constant 0 : index
    %c0_161 = arith.constant 0 : index
    %348 = vector.load %arg12[%c0_160, %c0_161] : memref<8x16xf32, #tpu.memory_space<vmem>>, vector<8x16xf32>
    tpu.vector_store %arg12[%c0_160, %c0_161], %347 {strides = array<i32>} : memref<8x16xf32, #tpu.memory_space<vmem>>, vector<8x16xf32>,
    return
  }
  func.func @transform_0(%arg0: i32) -> (i32, i32) {
    %c0_i32 = arith.constant 0 : i32
    %c0_i32_0 = arith.constant 0 : i32
    return %arg0, %c0_i32 : i32, i32
  }
  func.func @transform_1(%arg0: i32) -> (i32, i32) {
    %c0_i32 = arith.constant 0 : i32
    %c0_i32_0 = arith.constant 0 : i32
    %c0_i32_1 = arith.constant 0 : i32
    return %c0_i32, %c0_i32_0 : i32, i32
  }
  func.func @transform_2(%arg0: i32) -> (i32, i32) {
    %c0_i32 = arith.constant 0 : i32
    %c0_i32_0 = arith.constant 0 : i32
    %c0_i32_1 = arith.constant 0 : i32
    return %c0_i32, %c0_i32_0 : i32, i32
  }
  func.func @transform_3(%arg0: i32) -> (i32, i32, i32) {
    %c0_i32 = arith.constant 0 : i32
    %c0_i32_0 = arith.constant 0 : i32
    %c0_i32_1 = arith.constant 0 : i32
    %c0_i32_2 = arith.constant 0 : i32
    return %c0_i32, %c0_i32_0, %c0_i32_1 : i32, i32, i32
  }
  func.func @transform_4(%arg0: i32) -> (i32, i32, i32) {
    %c0_i32 = arith.constant 0 : i32
    %c0_i32_0 = arith.constant 0 : i32
    %c0_i32_1 = arith.constant 0 : i32
    %c0_i32_2 = arith.constant 0 : i32
    return %c0_i32, %c0_i32_0, %c0_i32_1 : i32, i32, i32
  }
  func.func @transform_5(%arg0: i32) -> (i32, i32, i32) {
    %c0_i32 = arith.constant 0 : i32
    %c0_i32_0 = arith.constant 0 : i32
    %c0_i32_1 = arith.constant 0 : i32
    %c0_i32_2 = arith.constant 0 : i32
    return %c0_i32, %c0_i32_0, %c0_i32_1 : i32, i32, i32
  }
  func.func @transform_6(%arg0: i32) -> (i32, i32, i32) {
    %c0_i32 = arith.constant 0 : i32
    %c0_i32_0 = arith.constant 0 : i32
    %c0_i32_1 = arith.constant 0 : i32
    %c0_i32_2 = arith.constant 0 : i32
    return %c0_i32, %c0_i32_0, %c0_i32_1 : i32, i32, i32
  }
  func.func @transform_7(%arg0: i32) -> (i32, i32, i32) {
    %c0_i32 = arith.constant 0 : i32
    %c0_i32_0 = arith.constant 0 : i32
    %c0_i32_1 = arith.constant 0 : i32
    %c0_i32_2 = arith.constant 0 : i32
    return %c0_i32, %c0_i32_0, %c0_i32_1 : i32, i32, i32
  }
  func.func @transform_8(%arg0: i32) -> (i32, i32, i32) {
    %c0_i32 = arith.constant 0 : i32
    %c0_i32_0 = arith.constant 0 : i32
    %c0_i32_1 = arith.constant 0 : i32
    %c0_i32_2 = arith.constant 0 : i32
    return %c0_i32, %c0_i32_0, %c0_i32_1 : i32, i32, i32
  }
  func.func @transform_9(%arg0: i32) -> (i32, i32) {
    %c0_i32 = arith.constant 0 : i32
    %c0_i32_0 = arith.constant 0 : i32
    %c0_i32_1 = arith.constant 0 : i32
    return %c0_i32, %c0_i32_0 : i32, i32
  }
  func.func @transform_10(%arg0: i32) -> i32 {
    %c0_i32 = arith.constant 0 : i32
    %c0_i32_0 = arith.constant 0 : i32
    return %c0_i32 : i32
  }
  func.func @transform_11(%arg0: i32) -> (i32, i32) {
    %c0_i32 = arith.constant 0 : i32
    %c0_i32_0 = arith.constant 0 : i32
    return %c0_i32, %arg0 : i32, i32
  }
}

</mosaic_0001>

<bundles_post_ra>
// kernel: forward.1
= control target key start
LH: loop header
LB: loop body
LE: loop exit
PB: predicated region body
PF: predicated region fallthrough
CT: control target
= control target key end

     0   :  { %v2869_v0 = vmov 0.0   ;;  %vm2870_vm0 = vmmov 0   ;;  %vm160_vm1 = vcmask 523264   ;;  %vm2170_vm2 = vcmask 130048   ;;  %s3498_s1 = inlined_call_operand.vmem [shape: bf16[128,64], index: 1, kind: input, shape index: {}]   ;;  %s3499_s0 = inlined_call_operand.vmem [shape: bf16[16,128], index: 0, kind: input, shape index: {}]   ;;  %s3500_s2 = inlined_call_operand.vmem [shape: f32[1,64], index: 2, kind: input, shape index: {}]   ;;  %s3501_s3 = inlined_call_operand.vmem [shape: bf16[4,64,64], index: 3, kind: input, shape index: {}]   ;;  %s3502_s4 = inlined_call_operand.vmem [shape: f32[4,1,64], index: 4, kind: input, shape index: {}]   ;;  %s3503_s5 = inlined_call_operand.vmem [shape: bf16[4,64,256], index: 5, kind: input, shape index: {}]   ;;  %s3504_s7 = inlined_call_operand.vmem [shape: bf16[4,256,64], index: 7, kind: input, shape index: {}]   ;;  %s3505_s6 = inlined_call_operand.vmem [shape: f32[4,1,256], index: 6, kind: input, shape index: {}]   ;;  %s3506_s8 = inlined_call_operand.vmem [shape: f32[4,1,64], index: 8, kind: input, shape index: {}]   ;;  %s3507_s9 = inlined_call_operand.vmem [shape: bf16[8,64], index: 9, kind: input, shape index: {}]   ;;  %s3508_s10 = inlined_call_operand.<no memory space> [shape: f32[1], index: 10, kind: input, shape index: {}]   ;;  %s3509_s11 = inlined_call_operand.vmem [shape: f32[8,16], index: 11, kind: output, shape index: {}]  }
   0x1   :  { %2587 = vmatprep.subr.bf16.mxu0 %v2869_v0  ;;  %v2664_v1 = vld [vmem:[%s3498_s1] sm:$0xff]   ;;  %2603 = vmatprep.mubr.msk.bf16.mxu0 %vm2870_vm0, %v2869_v0  ;;  %v2665_v2 = vld [vmem:[%s3498_s1 + $0x8] sm:$0xff]   ;;  %v2666_v3 = vld [vmem:[%s3498_s1 + $0x10] sm:$0xff]  }
   0x2   :  { %2607 = vmatprep.subr.bf16.mxu1 %v2869_v0  ;;  %2615 = vmatprep.mubr.msk.bf16.mxu1 %vm2870_vm0, %v2869_v0  ;;  %v2667_v4 = vld [vmem:[%s3498_s1 + $0x18] sm:$0xff]   ;;  %v2668_v5 = vld [vmem:[%s3498_s1 + $0x20] sm:$0xff]   ;;  %v2669_v6 = vld [vmem:[%s3498_s1 + $0x28] sm:$0xff]  }
   0x3   :  { %2588 = vmatpush3.bf16.msra.mxu0 %v2664_v1  ;;  %v2670_v7 = vld [vmem:[%s3498_s1 + $0x30] sm:$0xff]   ;;  %v2671_v8 = vld [vmem:[%s3498_s1 + $0x38] sm:$0xff]   ;;  %v2672_v9 = vld [vmem:[%s3499_s0] sm:$0xff]  }
   0x4   :  { %2589 = vmatprep.subr.bf16.mxu0 %v2869_v0  ;;  %v2176_v10 = vld [vmem:[%s3500_s2] ss:$0 sm:$0xff]  ;;  %v2674_v24 = vld [vmem:[%s3501_s3 + $0x8] sm:$0xff]   ;;  %v2675_v25 = vld [vmem:[%s3501_s3 + $0x10] sm:$0xff]  }
   0x5   :  { %v2673_v23 = vld [vmem:[%s3501_s3] sm:$0xff]   ;;  %v2676_v26 = vld [vmem:[%s3501_s3 + $0x18] sm:$0xff]  }
   0x6   :  { %2608 = vmatpush3.bf16.msra.mxu1 %v2673_v23  ;;  %v2191_v51 = vld [vmem:[%s3502_s4] ss:$0 sm:$0xff] }
   0x7   :  { %2590 = vmatpush3.bf16.msra.mxu0 %v2665_v2  ;;  %2609 = vmatprep.subr.bf16.mxu1 %v2869_v0  ;;  %v2679_v2 = vld [vmem:[%s3503_s5 + $0x4] ss:$8 sps:$4 sm:$0xff]  }
   0x8   :  { %2591 = vmatprep.subr.bf16.mxu0 %v2869_v0 }
   0xa   :  { %2610 = vmatpush3.bf16.msra.mxu1 %v2674_v24 }
   0xb   :  { %2592 = vmatpush3.bf16.msra.mxu0 %v2666_v3  ;;  %2611 = vmatprep.subr.bf16.mxu1 %v2869_v0  ;;  %v2677_v3 = vld [vmem:[%s3503_s5] ss:$8 sps:$4 sm:$0xff]  }
   0xc   :  { %2593 = vmatprep.subr.bf16.mxu0 %v2869_v0 }
   0xe   :  { %2612 = vmatpush3.bf16.msra.mxu1 %v2675_v25 }
   0xf   :  { %2594 = vmatpush3.bf16.msra.mxu0 %v2667_v4  ;;  %2613 = vmatprep.subr.bf16.mxu1 %v2869_v0  ;;  %v2680_v4 = vld [vmem:[%s3503_s5 + $0x10] ss:$8 sps:$4 sm:$0xff]  }
  0x10   :  { %2595 = vmatprep.subr.bf16.mxu0 %v2869_v0 }
  0x12   :  { %2614 = vmatpush3.bf16.msra.mxu1 %v2676_v26 }
  0x13   :  { %2596 = vmatpush3.bf16.msra.mxu0 %v2668_v5  ;;  %378 = vmatprep.subr.bf16.mxu1 %v2679_v2  ;;  %v2682_v5 = vld [vmem:[%s3503_s5 + $0x14] ss:$8 sps:$4 sm:$0xff]  }
  0x14   :  { %2597 = vmatprep.subr.bf16.mxu0 %v2869_v0 }
  0x17   :  { %2598 = vmatpush3.bf16.msra.mxu0 %v2669_v6  ;;  %v2685_v6 = vld [vmem:[%s3503_s5 + $0x24] ss:$8 sps:$4 sm:$0xff]  }
  0x18   :  { %2599 = vmatprep.subr.bf16.mxu0 %v2869_v0 }
  0x1b   :  { %2600 = vmatpush3.bf16.msra.mxu0 %v2670_v7  ;;  %v2683_v7 = vld [vmem:[%s3503_s5 + $0x20] ss:$8 sps:$4 sm:$0xff]  }
  0x1c   :  { %2601 = vmatprep.subr.bf16.mxu0 %v2869_v0 }
  0x1f   :  { %2602 = vmatpush3.bf16.msra.mxu0 %v2671_v8  ;;  %v2871_v8 = vmov 0  }
  0x22   :  { %2604 = vmatmul.mubr.bf16.vlgmr.msra.gmra.mrb[0].mxu0 %v2672_v9  ;;  %v2688_v9 = vld [vmem:[%s3503_s5 + $0x34] ss:$8 sps:$4 sm:$0xff]  }
  0xf5   :  { %v153_v11 = vpop.f32.mrb[0].mxu0 }
  0xf6   :  { %v154_v12 = vadd.f32 %v2176_v10, %v153_v11  ;;  %v2605_v13 = vpop.f32.mrb[1].mxu0 }
  0xf7   :  { %v156_v14 = vpop.f32.mrb[2].mxu0 }
  0xf8   :  { %v157_v15 = vadd.f32 %v2176_v10, %v156_v14  ;;  %v2606_v16 = vpop.f32.mrb[3].mxu0  ;;  %v161_v17 = vsel %vm160_vm1, %v154_v12, 0.0  ;;  %v170_v18 = vmul.f32 %v154_v12, %v154_v12  ;;  %v2686_v10 = vld [vmem:[%s3503_s5 + $0x30] ss:$8 sps:$4 sm:$0xff]  }
  0xf9   :  { %162 = vadd.xlane.f32.xlu0 %v161_v17 }
  0xfa   :  { %v172_v19 = vsel %vm160_vm1, %v170_v18, 0.0  ;;  %v171_v20 = vmul.f32 %v157_v15, %v157_v15  ;;  %v164_v21 = vsel %vm160_vm1, %v157_v15, 0.0 }
  0xfb   :  { %173 = vadd.xlane.f32.xlu1 %v172_v19 }
  0xfc   :  { %v175_v22 = vsel %vm160_vm1, %v171_v20, 0.0 }
  0xfd   :  { %165 = vadd.xlane.f32.xlu0 %v164_v21 }
  0xff   :  { %176 = vadd.xlane.f32.xlu1 %v175_v22 }
 0x186   :  { %v163_v27 = vpop.xlane.xlu0 %162 }
 0x187   :  { %v168_v28 = vmul.f32 0.015625, %v163_v27 }
 0x188   :  { %v174_v29 = vpop.xlane.xlu1 %173 }
 0x189   :  { %v180_v30 = vmul.f32 %v168_v28, %v168_v28  ;;  %v178_v31 = vmul.f32 0.015625, %v174_v29  ;;  %v186_v44 = vsub.f32 %v154_v12, %v168_v28 }
 0x18a   :  { %v166_v32 = vpop.xlane.xlu0 %165 }
 0x18b   :  { %v182_v33 = vsub.f32 %v178_v31, %v180_v30  ;;  %v169_v34 = vmul.f32 0.015625, %v166_v32 }
 0x18c   :  { %v177_v35 = vpop.xlane.xlu1 %176 }
 0x18d   :  { %v184_v36 = vmax.f32 %v182_v33, 0.0  ;;  %v181_v37 = vmul.f32 %v169_v34, %v169_v34  ;;  %v179_v38 = vmul.f32 0.015625, %v177_v35  ;;  %v187_v45 = vsub.f32 %v157_v15, %v169_v34  ;;  %v2689_v34 = vld [vmem:[%s3504_s7 + $0x40] sm:$0xff]  }
 0x18e   :  { %v2690_v35 = vld [vmem:[%s3504_s7] sm:$0xff]   ;;  %2482 = vmatprep.subr.bf16.mxu0 %v2689_v34 }
 0x18f   :  { %v188_v39 = vadd.f32 1e-05, %v184_v36  ;;  %v183_v40 = vsub.f32 %v179_v38, %v181_v37  ;;  %2483 = vmatpush3.bf16.msra.mxu0 %v2690_v35  ;;  %v2691_v36 = vld [vmem:[%s3504_s7 + $0x48] sm:$0xff]   ;;  %v2693_v38 = vld [vmem:[%s3504_s7 + $0x50] sm:$0xff]  }
 0x190   :  { %v2692_v37 = vld [vmem:[%s3504_s7 + $0x8] sm:$0xff]   ;;  %2484 = vmatprep.subr.bf16.mxu0 %v2691_v36 }
 0x191   :  { %v185_v41 = vmax.f32 %v183_v40, 0.0  ;;  %2801 = vrsqrt.f32 %v188_v39  ;;  %v2694_v39 = vld [vmem:[%s3504_s7 + $0x10] sm:$0xff]   ;;  %v2695_v40 = vld [vmem:[%s3504_s7 + $0x58] sm:$0xff]  }
 0x193   :  { %v189_v42 = vadd.f32 1e-05, %v185_v41  ;;  %2485 = vmatpush3.bf16.msra.mxu0 %v2692_v37  ;;  %v2696_v41 = vld [vmem:[%s3504_s7 + $0x18] sm:$0xff]  }
 0x194   :  { %2486 = vmatprep.subr.bf16.mxu0 %v2693_v38 }
 0x195   :  { %2803 = vrsqrt.f32 %v189_v42  ;;  %v2697_v42 = vld [vmem:[%s3504_s7 + $0x60] sm:$0xff]  }
 0x197   :  { %2487 = vmatpush3.bf16.msra.mxu0 %v2694_v39 }
 0x198   :  { %2488 = vmatprep.subr.bf16.mxu0 %v2695_v40 }
 0x19b   :  { %v2802_v43 = vpop.eup %2801  ;;  %2489 = vmatpush3.bf16.msra.mxu0 %v2696_v41 }
 0x19c   :  { %v192_v47 = vmul.f32 %v2802_v43, %v186_v44  ;;  %v2698_v43 = vld [vmem:[%s3504_s7 + $0x20] sm:$0xff]   ;;  %v2699_v44 = vld [vmem:[%s3504_s7 + $0x68] sm:$0xff]   ;;  %2490 = vmatprep.subr.bf16.mxu0 %v2697_v42 }
 0x19f   :  { %v2804_v46 = vpop.eup %2803  ;;  %2491 = vmatpush3.bf16.msra.mxu0 %v2698_v43 }
 0x1a0   :  { %v193_v48 = vmul.f32 %v2804_v46, %v187_v45  ;;  %v2700_v45 = vld [vmem:[%s3504_s7 + $0x28] sm:$0xff]   ;;  %v2701_v46 = vld [vmem:[%s3504_s7 + $0x70] sm:$0xff]   ;;  %2492 = vmatprep.subr.bf16.mxu0 %v2699_v44 }
 0x1a2   :  { %v202_v49 = vpack.c.bf16 %v193_v48, %v192_v47  ;;  %v2702_v47 = vld [vmem:[%s3504_s7 + $0x30] sm:$0xff]   ;;  %v2703_v48 = vld [vmem:[%s3504_s7 + $0x78] sm:$0xff]  }
 0x1a3   :  { %2493 = vmatpush3.bf16.msra.mxu0 %v2700_v45 }
 0x1a4   :  { %2616 = vmatmul.mubr.msk.bf16.vlgmr.msra.gmra.mrb[0].mxu1 %vm160_vm1, %v202_v49  ;;  %2494 = vmatprep.subr.bf16.mxu0 %v2701_v46  ;;  %v2704_v49 = vld [vmem:[%s3504_s7 + $0x38] sm:$0xff]  }
 0x1a5   :  { %379 = vmatpush1.bf16.msra.mxu1 %v2677_v3  ;;  %410 = vmatprep.mubr.bf16.mxu1 %v2871_v8 }
 0x1a6   :  { %380 = vmatprep.subr.bf16.mxu1 %v2682_v5 }
 0x1a7   :  { %2495 = vmatpush3.bf16.msra.mxu0 %v2702_v47  ;;  %v2217_v47 = vld [vmem:[%s3506_s8] ss:$0 sm:$0xff] }
 0x1a8   :  { %2496 = vmatprep.subr.bf16.mxu0 %v2703_v48 }
 0x1a9   :  { %381 = vmatpush1.bf16.msra.mxu1 %v2680_v4 }
 0x1aa   :  { %382 = vmatprep.subr.bf16.mxu1 %v2685_v6 }
 0x1ab   :  { %2497 = vmatpush3.bf16.msra.mxu0 %v2704_v49 }
 0x1ad   :  { %383 = vmatpush1.bf16.msra.mxu1 %v2683_v7 }
 0x1ae   :  { %384 = vmatprep.subr.bf16.mxu1 %v2688_v9 }
 0x1b1   :  { %385 = vmatpush1.bf16.msra.mxu1 %v2686_v10 }
 0x1b2   :  { %2619 = vmatprep.subr.bf16.mxu1 %v2869_v0 }
 0x277   :  { %v264_v50 = vpop.f32.mrb[0].mxu1 }
 0x278   :  { %v271_v52 = vadd.f32 %v264_v50, %v154_v12  ;;  %v2617_v53 = vpop.f32.mrb[1].mxu1  ;;  %v325_v50 = vlaneseq }
 0x279   :  { %v267_v54 = vpop.f32.mrb[2].mxu1  ;;  %v323_v53 = vld [vmem:[%s3505_s6] sm:$0x3] }
 0x27a   :  { %v2998_v55 = vadd.f32 %v2191_v51, %v271_v52  ;;  %v272_v56 = vadd.f32 %v267_v54, %v157_v15  ;;  %v2618_v57 = vpop.f32.mrb[3].mxu1 }
 0x27c   :  { %v3000_v58 = vadd.f32 %v2191_v51, %v272_v56  ;;  %v282_v59 = vsel %vm160_vm1, %v2998_v55, 0.0  ;;  %v290_v60 = vmul.f32 %v2998_v55, %v2998_v55  ;;  %v326_v51 = vshrl.u32 %v325_v50, 7 }
 0x27d   :  { %283 = vadd.xlane.f32.xlu0 %v282_v59 }
 0x27e   :  { %v285_v61 = vsel %vm160_vm1, %v3000_v58, 0.0  ;;  %v291_v62 = vmul.f32 %v3000_v58, %v3000_v58  ;;  %v292_v63 = vsel %vm160_vm1, %v290_v60, 0.0  ;;  %v3091_v52 = vsub.s32 0, %v326_v51 }
 0x27f   :  { %286 = vadd.xlane.f32.xlu1 %v285_v61  ;;  %v3096_v54 = vsub.s32 1, %v326_v51 }
 0x280   :  { %v295_v1 = vsel %vm160_vm1, %v291_v62, 0.0  ;;  %v328_v56 = vrot.slane %v323_v53, %v3091_v52 }
 0x281   :  { %293 = vadd.xlane.f32.xlu0 %v292_v63  ;;  %v332_v57 = vrot.slane %v323_v53, %v3096_v54 }
 0x283   :  { %296 = vadd.xlane.f32.xlu1 %v295_v1 }
 0x30a   :  { %v284_v11 = vpop.xlane.xlu0 %283 }
 0x30b   :  { %v288_v12 = vmul.f32 0.015625, %v284_v11 }
 0x30c   :  { %v287_v13 = vpop.xlane.xlu1 %286 }
 0x30d   :  { %v289_v14 = vmul.f32 0.015625, %v287_v13  ;;  %v300_v16 = vmul.f32 %v288_v12, %v288_v12  ;;  %v306_v28 = vsub.f32 %v2998_v55, %v288_v12 }
 0x30e   :  { %v294_v15 = vpop.xlane.xlu0 %293 }
 0x30f   :  { %v298_v17 = vmul.f32 0.015625, %v294_v15  ;;  %v301_v19 = vmul.f32 %v289_v14, %v289_v14  ;;  %v307_v29 = vsub.f32 %v3000_v58, %v289_v14 }
 0x310   :  { %v297_v18 = vpop.xlane.xlu1 %296 }
 0x311   :  { %v302_v20 = vsub.f32 %v298_v17, %v300_v16  ;;  %v299_v21 = vmul.f32 0.015625, %v297_v18 }
 0x313   :  { %v304_v22 = vmax.f32 %v302_v20, 0.0  ;;  %v303_v23 = vsub.f32 %v299_v21, %v301_v19 }
 0x315   :  { %v308_v24 = vadd.f32 1e-05, %v304_v22  ;;  %v305_v25 = vmax.f32 %v303_v23, 0.0 }
 0x317   :  { %2805 = vrsqrt.f32 %v308_v24  ;;  %v309_v26 = vadd.f32 1e-05, %v305_v25 }
 0x319   :  { %2807 = vrsqrt.f32 %v309_v26 }
 0x321   :  { %v2806_v27 = vpop.eup %2805 }
 0x322   :  { %v312_v31 = vmul.f32 %v2806_v27, %v306_v28 }
 0x323   :  { %v2808_v30 = vpop.eup %2807 }
 0x324   :  { %v313_v32 = vmul.f32 %v2808_v30, %v307_v29 }
 0x326   :  { %v322_v33 = vpack.c.bf16 %v313_v32, %v312_v31 }
 0x328   :  { %2200 = vmatmul.mubr.msk.bf16.vlgmr.msra.gmra.mrb[4].mxu1 %vm160_vm1, %v322_v33 }
 0x329   :  { %2627 = vmatprep.mubr.msk.bf16.mxu1 %vm2870_vm0, %v2869_v0 }
 0x3fb   :  { %v412_v59 = vpop.f32.mrb[4].mxu1 }
 0x3fc   :  { %v413_v60 = vadd.f32 %v412_v59, %v328_v56  ;;  %v414_v61 = vpop.f32.mrb[5].mxu1 }
 0x3fd   :  { %v415_v62 = vadd.f32 %v414_v61, %v332_v57  ;;  %v416_v63 = vpop.f32.mrb[6].mxu1 }
 0x3fe   :  { %v425_v1 = vmul.f32 0.044715, %v413_v60  ;;  %v417_v2 = vadd.f32 %v416_v63, %v328_v56  ;;  %v418_v3 = vpop.f32.mrb[7].mxu1  ;;  %v421_v31 = vmul.f32 0.5, %v413_v60 }
 0x3ff   :  { %v426_v4 = vmul.f32 0.044715, %v415_v62  ;;  %v419_v5 = vadd.f32 %v418_v3, %v332_v57  ;;  %v422_v34 = vmul.f32 0.5, %v415_v62 }
 0x400   :  { %v429_v6 = vmul.f32 %v425_v1, %v413_v60  ;;  %v427_v7 = vmul.f32 0.044715, %v417_v2  ;;  %v423_v32 = vmul.f32 0.5, %v417_v2  ;;  %v2707_v1 = vld [vmem:[%s3501_s3 + $0x30] sm:$0xff]  }
 0x401   :  { %v430_v9 = vmul.f32 %v426_v4, %v415_v62  ;;  %v428_v10 = vmul.f32 0.044715, %v419_v5  ;;  %v424_v35 = vmul.f32 0.5, %v419_v5 }
 0x402   :  { %v433_v11 = vmul.f32 %v429_v6, %v413_v60  ;;  %v431_v12 = vmul.f32 %v427_v7, %v417_v2 }
 0x403   :  { %v434_v13 = vmul.f32 %v430_v9, %v415_v62  ;;  %v432_v14 = vmul.f32 %v428_v10, %v419_v5 }
 0x404   :  { %v437_v15 = vadd.f32 %v433_v11, %v413_v60  ;;  %v435_v16 = vmul.f32 %v431_v12, %v417_v2 }
 0x405   :  { %v436_v17 = vmul.f32 %v432_v14, %v419_v5  ;;  %v438_v18 = vadd.f32 %v434_v13, %v415_v62 }
 0x406   :  { %v441_v19 = vmul.f32 0.7978846, %v437_v15  ;;  %v439_v20 = vadd.f32 %v435_v16, %v417_v2  ;;  %v2708_v2 = vld [vmem:[%s3501_s3 + $0x38] sm:$0xff]  }
 0x407   :  { %v440_v21 = vadd.f32 %v436_v17, %v419_v5  ;;  %v442_v22 = vmul.f32 0.7978846, %v438_v18 }
 0x408   :  { %2809 = vtanh.f32 %v441_v19  ;;  %v443_v23 = vmul.f32 0.7978846, %v439_v20 }
 0x409   :  { %v444_v24 = vmul.f32 0.7978846, %v440_v21  ;;  %2811 = vtanh.f32 %v442_v22 }
 0x40a   :  { %2813 = vtanh.f32 %v443_v23 }
 0x40b   :  { %2815 = vtanh.f32 %v444_v24 }
 0x412   :  { %v2810_v25 = vpop.eup %2809 }
 0x413   :  { %v2812_v26 = vpop.eup %2811  ;;  %v449_v27 = vadd.f32 1.0, %v2810_v25 }
 0x414   :  { %v2814_v28 = vpop.eup %2813  ;;  %v450_v29 = vadd.f32 1.0, %v2812_v26 }
 0x415   :  { %v2816_v30 = vpop.eup %2815  ;;  %v451_v33 = vadd.f32 1.0, %v2814_v28  ;;  %v453_v37 = vmul.f32 %v449_v27, %v421_v31  ;;  %v2232_v28 = vld [vmem:[%s3502_s4 + $0x1] ss:$0 sm:$0xff] }
 0x416   :  { %v452_v36 = vadd.f32 1.0, %v2816_v30  ;;  %v454_v39 = vmul.f32 %v450_v29, %v422_v34 }
 0x417   :  { %v455_v38 = vmul.f32 %v451_v33, %v423_v32 }
 0x418   :  { %v456_v40 = vmul.f32 %v452_v36, %v424_v35 }
 0x419   :  { %v457_v41 = vpack.c.bf16 %v455_v38, %v453_v37 }
 0x41a   :  { %v458_v42 = vpack.c.bf16 %v456_v40, %v454_v39 }
 0x41c   :  { %619 = vmatprep.mubr.bf16.mxu0 %v458_v42  ;;  %v2711_v42 = vld [vmem:[%s3503_s5 + $0x44] ss:$8 sps:$4 sm:$0xff]  }
 0x41d   :  { %620 = vmatmul.mubr.bf16.vlgmr.msra.gmra.mrb[4].mxu0 %v457_v41 }
 0x4f0   :  { %v2498_v43 = vpop.f32.mrb[4].mxu0 }
 0x4f1   :  { %v2499_v44 = vpop.f32.mrb[5].mxu0 }
 0x4f2   :  { %v2500_v45 = vadd.f32 %v2499_v44, %v2498_v43  ;;  %v2501_v46 = vpop.f32.mrb[6].mxu0  ;;  %v2709_v43 = vld [vmem:[%s3503_s5 + $0x40] ss:$8 sps:$4 sm:$0xff]   ;;  %v2712_v44 = vld [vmem:[%s3503_s5 + $0x50] ss:$8 sps:$4 sm:$0xff]  }
 0x4f3   :  { %v2502_v48 = vpop.f32.mrb[7].mxu0 }
 0x4f4   :  { %v628_v49 = vadd.f32 %v2500_v45, %v2998_v55  ;;  %v2503_v50 = vadd.f32 %v2502_v48, %v2501_v46  ;;  %v2705_v55 = vld [vmem:[%s3501_s3 + $0x20] sm:$0xff]   ;;  %v2714_v45 = vld [vmem:[%s3503_s5 + $0x54] ss:$8 sps:$4 sm:$0xff]  }
 0x4f5   :  { %2620 = vmatpush3.bf16.msra.mxu1 %v2705_v55  ;;  %v2717_v46 = vld [vmem:[%s3503_s5 + $0x64] ss:$8 sps:$4 sm:$0xff]   ;;  %v2720_v48 = vld [vmem:[%s3503_s5 + $0x74] ss:$8 sps:$4 sm:$0xff]  }
 0x4f6   :  { %v637_v51 = vadd.f32 %v2217_v47, %v628_v49  ;;  %v629_v53 = vadd.f32 %v2503_v50, %v3000_v58  ;;  %v2706_v58 = vld [vmem:[%s3501_s3 + $0x28] sm:$0xff]   ;;  %2621 = vmatprep.subr.bf16.mxu1 %v2869_v0  ;;  %v2718_v49 = vld [vmem:[%s3503_s5 + $0x70] ss:$8 sps:$4 sm:$0xff]  }
 0x4f8   :  { %v638_v56 = vadd.f32 %v2217_v47, %v629_v53  ;;  %v639_v57 = vsel %vm160_vm1, %v637_v51, 0.0  ;;  %v647_v59 = vmul.f32 %v637_v51, %v637_v51  ;;  %v2715_v47 = vld [vmem:[%s3503_s5 + $0x60] ss:$8 sps:$4 sm:$0xff]  }
 0x4f9   :  { %640 = vadd.xlane.f32.xlu0 %v639_v57  ;;  %2622 = vmatpush3.bf16.msra.mxu1 %v2706_v58 }
 0x4fa   :  { %v642_v60 = vsel %vm160_vm1, %v638_v56, 0.0  ;;  %v648_v61 = vmul.f32 %v638_v56, %v638_v56  ;;  %v649_v62 = vsel %vm160_vm1, %v647_v59, 0.0  ;;  %2623 = vmatprep.subr.bf16.mxu1 %v2869_v0 }
 0x4fb   :  { %643 = vadd.xlane.f32.xlu1 %v642_v60 }
 0x4fc   :  { %v652_v63 = vsel %vm160_vm1, %v648_v61, 0.0 }
 0x4fd   :  { %650 = vadd.xlane.f32.xlu0 %v649_v62  ;;  %2624 = vmatpush3.bf16.msra.mxu1 %v2707_v1 }
 0x4fe   :  { %2625 = vmatprep.subr.bf16.mxu1 %v2869_v0 }
 0x4ff   :  { %653 = vadd.xlane.f32.xlu1 %v652_v63 }
 0x501   :  { %2626 = vmatpush3.bf16.msra.mxu1 %v2708_v2 }
 0x502   :  { %859 = vmatprep.subr.bf16.mxu1 %v2711_v42 }
 0x586   :  { %v641_v3 = vpop.xlane.xlu0 %640 }
 0x587   :  { %v645_v4 = vmul.f32 0.015625, %v641_v3 }
 0x588   :  { %v644_v5 = vpop.xlane.xlu1 %643 }
 0x589   :  { %v646_v6 = vmul.f32 0.015625, %v644_v5  ;;  %v657_v9 = vmul.f32 %v645_v4, %v645_v4  ;;  %v663_v21 = vsub.f32 %v637_v51, %v645_v4 }
 0x58a   :  { %v651_v7 = vpop.xlane.xlu0 %650 }
 0x58b   :  { %v655_v10 = vmul.f32 0.015625, %v651_v7  ;;  %v658_v12 = vmul.f32 %v646_v6, %v646_v6  ;;  %v664_v22 = vsub.f32 %v638_v56, %v646_v6 }
 0x58c   :  { %v654_v11 = vpop.xlane.xlu1 %653 }
 0x58d   :  { %v659_v13 = vsub.f32 %v655_v10, %v657_v9  ;;  %v656_v14 = vmul.f32 0.015625, %v654_v11 }
 0x58f   :  { %v661_v15 = vmax.f32 %v659_v13, 0.0  ;;  %v660_v16 = vsub.f32 %v656_v14, %v658_v12  ;;  %v2721_v13 = vld [vmem:[%s3504_s7 + $0xc0] sm:$0xff]  }
 0x590   :  { %v2722_v14 = vld [vmem:[%s3504_s7 + $0x80] sm:$0xff]   ;;  %2509 = vmatprep.subr.bf16.mxu0 %v2721_v13 }
 0x591   :  { %v665_v17 = vadd.f32 1e-05, %v661_v15  ;;  %v662_v18 = vmax.f32 %v660_v16, 0.0  ;;  %2510 = vmatpush3.bf16.msra.mxu0 %v2722_v14  ;;  %v2723_v15 = vld [vmem:[%s3504_s7 + $0xc8] sm:$0xff]  }
 0x592   :  { %v2724_v16 = vld [vmem:[%s3504_s7 + $0x88] sm:$0xff]   ;;  %2511 = vmatprep.subr.bf16.mxu0 %v2723_v15 }
 0x593   :  { %2817 = vrsqrt.f32 %v665_v17  ;;  %v666_v19 = vadd.f32 1e-05, %v662_v18  ;;  %v2725_v17 = vld [vmem:[%s3504_s7 + $0xd0] sm:$0xff]  }
 0x594   :  { %v2726_v18 = vld [vmem:[%s3504_s7 + $0x90] sm:$0xff]  }
 0x595   :  { %2819 = vrsqrt.f32 %v666_v19  ;;  %2512 = vmatpush3.bf16.msra.mxu0 %v2724_v16  ;;  %v2727_v19 = vld [vmem:[%s3504_s7 + $0xd8] sm:$0xff]  }
 0x596   :  { %2513 = vmatprep.subr.bf16.mxu0 %v2725_v17 }
 0x599   :  { %2514 = vmatpush3.bf16.msra.mxu0 %v2726_v18 }
 0x59a   :  { %2515 = vmatprep.subr.bf16.mxu0 %v2727_v19 }
 0x59d   :  { %v2818_v20 = vpop.eup %2817 }
 0x59e   :  { %v669_v24 = vmul.f32 %v2818_v20, %v663_v21  ;;  %v2728_v20 = vld [vmem:[%s3504_s7 + $0x98] sm:$0xff]   ;;  %v2729_v21 = vld [vmem:[%s3504_s7 + $0xe0] sm:$0xff]  }
 0x59f   :  { %v2820_v23 = vpop.eup %2819  ;;  %2516 = vmatpush3.bf16.msra.mxu0 %v2728_v20 }
 0x5a0   :  { %v670_v25 = vmul.f32 %v2820_v23, %v664_v22  ;;  %v2730_v22 = vld [vmem:[%s3504_s7 + $0xa0] sm:$0xff]   ;;  %v2731_v23 = vld [vmem:[%s3504_s7 + $0xe8] sm:$0xff]   ;;  %2517 = vmatprep.subr.bf16.mxu0 %v2729_v21 }
 0x5a2   :  { %v680_v26 = vpack.c.bf16 %v670_v25, %v669_v24  ;;  %v2732_v24 = vld [vmem:[%s3504_s7 + $0xa8] sm:$0xff]   ;;  %v2733_v25 = vld [vmem:[%s3504_s7 + $0xf0] sm:$0xff]  }
 0x5a3   :  { %2518 = vmatpush3.bf16.msra.mxu0 %v2730_v22 }
 0x5a4   :  { %2628 = vmatmul.mubr.msk.bf16.vlgmr.msra.gmra.mrb[8].mxu1 %vm160_vm1, %v680_v26  ;;  %2519 = vmatprep.subr.bf16.mxu0 %v2731_v23  ;;  %v2734_v26 = vld [vmem:[%s3504_s7 + $0xb0] sm:$0xff]  }
 0x5a5   :  { %891 = vmatprep.mubr.bf16.mxu1 %v2871_v8  ;;  %860 = vmatpush1.bf16.msra.mxu1 %v2709_v43 }
 0x5a6   :  { %861 = vmatprep.subr.bf16.mxu1 %v2714_v45 }
 0x5a7   :  { %2520 = vmatpush3.bf16.msra.mxu0 %v2732_v24  ;;  %v2300_v24 = vld [vmem:[%s3506_s8 + $0x1] ss:$0 sm:$0xff] }
 0x5a8   :  { %2521 = vmatprep.subr.bf16.mxu0 %v2733_v25 }
 0x5a9   :  { %862 = vmatpush1.bf16.msra.mxu1 %v2712_v44 }
 0x5aa   :  { %863 = vmatprep.subr.bf16.mxu1 %v2717_v46 }
 0x5ab   :  { %2522 = vmatpush3.bf16.msra.mxu0 %v2734_v26 }
 0x5ad   :  { %864 = vmatpush1.bf16.msra.mxu1 %v2715_v47 }
 0x5ae   :  { %865 = vmatprep.subr.bf16.mxu1 %v2720_v48 }
 0x5b1   :  { %866 = vmatpush1.bf16.msra.mxu1 %v2718_v49 }
 0x5b2   :  { %2631 = vmatprep.subr.bf16.mxu1 %v2869_v0 }
 0x677   :  { %v742_v27 = vpop.f32.mrb[8].mxu1 }
 0x678   :  { %v749_v29 = vadd.f32 %v742_v27, %v637_v51  ;;  %v2629_v30 = vpop.f32.mrb[9].mxu1  ;;  %v2735_v27 = vld [vmem:[%s3504_s7 + $0xf8] sm:$0xff]  }
 0x679   :  { %v745_v31 = vpop.f32.mrb[10].mxu1  ;;  %2523 = vmatprep.subr.bf16.mxu0 %v2735_v27 }
 0x67a   :  { %v3129_v32 = vadd.f32 %v2232_v28, %v749_v29  ;;  %v750_v33 = vadd.f32 %v745_v31, %v638_v56  ;;  %v2630_v34 = vpop.f32.mrb[11].mxu1  ;;  %v2241_v29 = vld [vmem:[%s3505_s6 + $0x2] sm:$0x3] }
 0x67b   :  { %v809_v30 = vrot.slane %v2241_v29, %v3091_v52  ;;  %v813_v31 = vrot.slane %v2241_v29, %v3096_v54 }
 0x67c   :  { %v3131_v35 = vadd.f32 %v2232_v28, %v750_v33  ;;  %v761_v36 = vsel %vm160_vm1, %v3129_v32, 0.0  ;;  %v769_v37 = vmul.f32 %v3129_v32, %v3129_v32  ;;  %v2736_v28 = vld [vmem:[%s3504_s7 + $0xb8] sm:$0xff]  }
 0x67d   :  { %762 = vadd.xlane.f32.xlu0 %v761_v36  ;;  %2524 = vmatpush3.bf16.msra.mxu0 %v2736_v28 }
 0x67e   :  { %v764_v38 = vsel %vm160_vm1, %v3131_v35, 0.0  ;;  %v770_v39 = vmul.f32 %v3131_v35, %v3131_v35  ;;  %v771_v40 = vsel %vm160_vm1, %v769_v37, 0.0 }
 0x67f   :  { %765 = vadd.xlane.f32.xlu1 %v764_v38 }
 0x680   :  { %v774_v41 = vsel %vm160_vm1, %v770_v39, 0.0 }
 0x681   :  { %772 = vadd.xlane.f32.xlu0 %v771_v40 }
 0x683   :  { %775 = vadd.xlane.f32.xlu1 %v774_v41 }
 0x70a   :  { %v763_v50 = vpop.xlane.xlu0 %762 }
 0x70b   :  { %v767_v51 = vmul.f32 0.015625, %v763_v50 }
 0x70c   :  { %v766_v53 = vpop.xlane.xlu1 %765 }
 0x70d   :  { %v768_v56 = vmul.f32 0.015625, %v766_v53  ;;  %v779_v59 = vmul.f32 %v767_v51, %v767_v51  ;;  %v785_v6 = vsub.f32 %v3129_v32, %v767_v51 }
 0x70e   :  { %v773_v57 = vpop.xlane.xlu0 %772 }
 0x70f   :  { %v777_v60 = vmul.f32 0.015625, %v773_v57  ;;  %v780_v62 = vmul.f32 %v768_v56, %v768_v56  ;;  %v786_v7 = vsub.f32 %v3131_v35, %v768_v56 }
 0x710   :  { %v776_v61 = vpop.xlane.xlu1 %775 }
 0x711   :  { %v781_v63 = vsub.f32 %v777_v60, %v779_v59  ;;  %v778_v55 = vmul.f32 0.015625, %v776_v61 }
 0x713   :  { %v783_v58 = vmax.f32 %v781_v63, 0.0  ;;  %v782_v1 = vsub.f32 %v778_v55, %v780_v62 }
 0x715   :  { %v787_v2 = vadd.f32 1e-05, %v783_v58  ;;  %v784_v3 = vmax.f32 %v782_v1, 0.0 }
 0x717   :  { %2821 = vrsqrt.f32 %v787_v2  ;;  %v788_v4 = vadd.f32 1e-05, %v784_v3 }
 0x719   :  { %2823 = vrsqrt.f32 %v788_v4 }
 0x721   :  { %v2822_v5 = vpop.eup %2821 }
 0x722   :  { %v791_v10 = vmul.f32 %v2822_v5, %v785_v6 }
 0x723   :  { %v2824_v9 = vpop.eup %2823 }
 0x724   :  { %v792_v11 = vmul.f32 %v2824_v9, %v786_v7 }
 0x726   :  { %v802_v12 = vpack.c.bf16 %v792_v11, %v791_v10 }
 0x728   :  { %2250 = vmatmul.mubr.msk.bf16.vlgmr.msra.gmra.mrb[12].mxu1 %vm160_vm1, %v802_v12 }
 0x729   :  { %2639 = vmatprep.mubr.msk.bf16.mxu1 %vm2870_vm0, %v2869_v0 }
 0x7fb   :  { %v893_v33 = vpop.f32.mrb[12].mxu1 }
 0x7fc   :  { %v894_v34 = vadd.f32 %v893_v33, %v809_v30  ;;  %v895_v36 = vpop.f32.mrb[13].mxu1 }
 0x7fd   :  { %v896_v37 = vadd.f32 %v895_v36, %v813_v31  ;;  %v897_v38 = vpop.f32.mrb[14].mxu1 }
 0x7fe   :  { %v906_v39 = vmul.f32 0.044715, %v894_v34  ;;  %v898_v40 = vadd.f32 %v897_v38, %v809_v30  ;;  %v899_v41 = vpop.f32.mrb[15].mxu1  ;;  %v902_v7 = vmul.f32 0.5, %v894_v34 }
 0x7ff   :  { %v907_v42 = vmul.f32 0.044715, %v896_v37  ;;  %v900_v43 = vadd.f32 %v899_v41, %v813_v31  ;;  %v903_v11 = vmul.f32 0.5, %v896_v37 }
 0x800   :  { %v910_v44 = vmul.f32 %v906_v39, %v894_v34  ;;  %v908_v45 = vmul.f32 0.044715, %v898_v40  ;;  %v904_v9 = vmul.f32 0.5, %v898_v40  ;;  %v2739_v39 = vld [vmem:[%s3501_s3 + $0x50] sm:$0xff]  }
 0x801   :  { %v911_v46 = vmul.f32 %v907_v42, %v896_v37  ;;  %v909_v47 = vmul.f32 0.044715, %v900_v43  ;;  %v905_v12 = vmul.f32 0.5, %v900_v43 }
 0x802   :  { %v914_v48 = vmul.f32 %v910_v44, %v894_v34  ;;  %v912_v49 = vmul.f32 %v908_v45, %v898_v40 }
 0x803   :  { %v915_v50 = vmul.f32 %v911_v46, %v896_v37  ;;  %v913_v51 = vmul.f32 %v909_v47, %v900_v43 }
 0x804   :  { %v918_v53 = vadd.f32 %v914_v48, %v894_v34  ;;  %v916_v56 = vmul.f32 %v912_v49, %v898_v40 }
 0x805   :  { %v917_v57 = vmul.f32 %v913_v51, %v900_v43  ;;  %v919_v59 = vadd.f32 %v915_v50, %v896_v37 }
 0x806   :  { %v922_v60 = vmul.f32 0.7978846, %v918_v53  ;;  %v920_v61 = vadd.f32 %v916_v56, %v898_v40  ;;  %v2740_v40 = vld [vmem:[%s3501_s3 + $0x58] sm:$0xff]  }
 0x807   :  { %v921_v62 = vadd.f32 %v917_v57, %v900_v43  ;;  %v923_v63 = vmul.f32 0.7978846, %v919_v59 }
 0x808   :  { %2825 = vtanh.f32 %v922_v60  ;;  %v924_v55 = vmul.f32 0.7978846, %v920_v61 }
 0x809   :  { %v925_v58 = vmul.f32 0.7978846, %v921_v62  ;;  %2827 = vtanh.f32 %v923_v63 }
 0x80a   :  { %2829 = vtanh.f32 %v924_v55 }
 0x80b   :  { %2831 = vtanh.f32 %v925_v58 }
 0x812   :  { %v2826_v1 = vpop.eup %2825 }
 0x813   :  { %v2828_v2 = vpop.eup %2827  ;;  %v930_v3 = vadd.f32 1.0, %v2826_v1 }
 0x814   :  { %v2830_v4 = vpop.eup %2829  ;;  %v931_v5 = vadd.f32 1.0, %v2828_v2 }
 0x815   :  { %v2832_v6 = vpop.eup %2831  ;;  %v932_v10 = vadd.f32 1.0, %v2830_v4  ;;  %v934_v14 = vmul.f32 %v930_v3, %v902_v7  ;;  %v2315_v4 = vld [vmem:[%s3502_s4 + $0x2] ss:$0 sm:$0xff] }
 0x816   :  { %v933_v13 = vadd.f32 1.0, %v2832_v6  ;;  %v935_v16 = vmul.f32 %v931_v5, %v903_v11 }
 0x817   :  { %v936_v15 = vmul.f32 %v932_v10, %v904_v9 }
 0x818   :  { %v937_v17 = vmul.f32 %v933_v13, %v905_v12 }
 0x819   :  { %v938_v18 = vpack.c.bf16 %v936_v15, %v934_v14 }
 0x81a   :  { %v939_v19 = vpack.c.bf16 %v937_v17, %v935_v16 }
 0x81c   :  { %1101 = vmatprep.mubr.bf16.mxu0 %v939_v19  ;;  %v2743_v19 = vld [vmem:[%s3503_s5 + $0x84] ss:$8 sps:$4 sm:$0xff]  }
 0x81d   :  { %1102 = vmatmul.mubr.bf16.vlgmr.msra.gmra.mrb[8].mxu0 %v938_v18 }
 0x8f0   :  { %v2525_v20 = vpop.f32.mrb[8].mxu0 }
 0x8f1   :  { %v2526_v21 = vpop.f32.mrb[9].mxu0 }
 0x8f2   :  { %v2527_v22 = vadd.f32 %v2526_v21, %v2525_v20  ;;  %v2528_v23 = vpop.f32.mrb[10].mxu0  ;;  %v2741_v20 = vld [vmem:[%s3503_s5 + $0x80] ss:$8 sps:$4 sm:$0xff]   ;;  %v2744_v21 = vld [vmem:[%s3503_s5 + $0x90] ss:$8 sps:$4 sm:$0xff]  }
 0x8f3   :  { %v2529_v25 = vpop.f32.mrb[11].mxu0 }
 0x8f4   :  { %v1110_v26 = vadd.f32 %v2527_v22, %v3129_v32  ;;  %v2530_v27 = vadd.f32 %v2529_v25, %v2528_v23  ;;  %v2737_v32 = vld [vmem:[%s3501_s3 + $0x40] sm:$0xff]   ;;  %v2746_v22 = vld [vmem:[%s3503_s5 + $0x94] ss:$8 sps:$4 sm:$0xff]  }
 0x8f5   :  { %2632 = vmatpush3.bf16.msra.mxu1 %v2737_v32  ;;  %v2749_v23 = vld [vmem:[%s3503_s5 + $0xa4] ss:$8 sps:$4 sm:$0xff]   ;;  %v2752_v25 = vld [vmem:[%s3503_s5 + $0xb4] ss:$8 sps:$4 sm:$0xff]  }
 0x8f6   :  { %v1120_v28 = vadd.f32 %v2300_v24, %v1110_v26  ;;  %v1111_v29 = vadd.f32 %v2530_v27, %v3131_v35  ;;  %v2738_v35 = vld [vmem:[%s3501_s3 + $0x48] sm:$0xff]   ;;  %2633 = vmatprep.subr.bf16.mxu1 %v2869_v0  ;;  %v2750_v26 = vld [vmem:[%s3503_s5 + $0xb0] ss:$8 sps:$4 sm:$0xff]  }
 0x8f8   :  { %v1121_v30 = vadd.f32 %v2300_v24, %v1111_v29  ;;  %v1122_v31 = vsel %vm160_vm1, %v1120_v28, 0.0  ;;  %v1130_v33 = vmul.f32 %v1120_v28, %v1120_v28  ;;  %v2747_v24 = vld [vmem:[%s3503_s5 + $0xa0] ss:$8 sps:$4 sm:$0xff]  }
 0x8f9   :  { %1123 = vadd.xlane.f32.xlu0 %v1122_v31  ;;  %2634 = vmatpush3.bf16.msra.mxu1 %v2738_v35 }
 0x8fa   :  { %v1125_v34 = vsel %vm160_vm1, %v1121_v30, 0.0  ;;  %v1131_v36 = vmul.f32 %v1121_v30, %v1121_v30  ;;  %v1132_v37 = vsel %vm160_vm1, %v1130_v33, 0.0  ;;  %2635 = vmatprep.subr.bf16.mxu1 %v2869_v0 }
 0x8fb   :  { %1126 = vadd.xlane.f32.xlu1 %v1125_v34 }
 0x8fc   :  { %v1135_v38 = vsel %vm160_vm1, %v1131_v36, 0.0 }
 0x8fd   :  { %1133 = vadd.xlane.f32.xlu0 %v1132_v37  ;;  %2636 = vmatpush3.bf16.msra.mxu1 %v2739_v39 }
 0x8fe   :  { %2637 = vmatprep.subr.bf16.mxu1 %v2869_v0 }
 0x8ff   :  { %1136 = vadd.xlane.f32.xlu1 %v1135_v38 }
 0x901   :  { %2638 = vmatpush3.bf16.msra.mxu1 %v2740_v40 }
 0x902   :  { %1342 = vmatprep.subr.bf16.mxu1 %v2743_v19 }
 0x986   :  { %v1124_v41 = vpop.xlane.xlu0 %1123 }
 0x987   :  { %v1128_v42 = vmul.f32 0.015625, %v1124_v41 }
 0x988   :  { %v1127_v43 = vpop.xlane.xlu1 %1126 }
 0x989   :  { %v1129_v44 = vmul.f32 0.015625, %v1127_v43  ;;  %v1140_v46 = vmul.f32 %v1128_v42, %v1128_v42  ;;  %v1146_v62 = vsub.f32 %v1120_v28, %v1128_v42 }
 0x98a   :  { %v1134_v45 = vpop.xlane.xlu0 %1133 }
 0x98b   :  { %v1138_v47 = vmul.f32 0.015625, %v1134_v45  ;;  %v1141_v49 = vmul.f32 %v1129_v44, %v1129_v44  ;;  %v1147_v63 = vsub.f32 %v1121_v30, %v1129_v44 }
 0x98c   :  { %v1137_v48 = vpop.xlane.xlu1 %1136 }
 0x98d   :  { %v1142_v50 = vsub.f32 %v1138_v47, %v1140_v46  ;;  %v1139_v51 = vmul.f32 0.015625, %v1137_v48 }
 0x98f   :  { %v1144_v53 = vmax.f32 %v1142_v50, 0.0  ;;  %v1143_v56 = vsub.f32 %v1139_v51, %v1141_v49  ;;  %v2753_v50 = vld [vmem:[%s3504_s7 + $0x140] sm:$0xff]  }
 0x990   :  { %v2754_v51 = vld [vmem:[%s3504_s7 + $0x100] sm:$0xff]   ;;  %2536 = vmatprep.subr.bf16.mxu0 %v2753_v50 }
 0x991   :  { %v1148_v57 = vadd.f32 1e-05, %v1144_v53  ;;  %v1145_v59 = vmax.f32 %v1143_v56, 0.0  ;;  %2537 = vmatpush3.bf16.msra.mxu0 %v2754_v51  ;;  %v2755_v53 = vld [vmem:[%s3504_s7 + $0x148] sm:$0xff]  }
 0x992   :  { %v2756_v56 = vld [vmem:[%s3504_s7 + $0x108] sm:$0xff]   ;;  %2538 = vmatprep.subr.bf16.mxu0 %v2755_v53 }
 0x993   :  { %2833 = vrsqrt.f32 %v1148_v57  ;;  %v1149_v60 = vadd.f32 1e-05, %v1145_v59  ;;  %v2757_v57 = vld [vmem:[%s3504_s7 + $0x150] sm:$0xff]  }
 0x994   :  { %v2758_v59 = vld [vmem:[%s3504_s7 + $0x110] sm:$0xff]  }
 0x995   :  { %2835 = vrsqrt.f32 %v1149_v60  ;;  %2539 = vmatpush3.bf16.msra.mxu0 %v2756_v56  ;;  %v2759_v60 = vld [vmem:[%s3504_s7 + $0x158] sm:$0xff]  }
 0x996   :  { %2540 = vmatprep.subr.bf16.mxu0 %v2757_v57 }
 0x999   :  { %2541 = vmatpush3.bf16.msra.mxu0 %v2758_v59 }
 0x99a   :  { %2542 = vmatprep.subr.bf16.mxu0 %v2759_v60 }
 0x99d   :  { %v2834_v61 = vpop.eup %2833 }
 0x99e   :  { %v1152_v58 = vmul.f32 %v2834_v61, %v1146_v62  ;;  %v2760_v61 = vld [vmem:[%s3504_s7 + $0x118] sm:$0xff]   ;;  %v2761_v62 = vld [vmem:[%s3504_s7 + $0x160] sm:$0xff]  }
 0x99f   :  { %v2836_v55 = vpop.eup %2835  ;;  %2543 = vmatpush3.bf16.msra.mxu0 %v2760_v61 }
 0x9a0   :  { %v1153_v1 = vmul.f32 %v2836_v55, %v1147_v63  ;;  %v2762_v63 = vld [vmem:[%s3504_s7 + $0x120] sm:$0xff]   ;;  %v2763_v55 = vld [vmem:[%s3504_s7 + $0x168] sm:$0xff]   ;;  %2544 = vmatprep.subr.bf16.mxu0 %v2761_v62 }
 0x9a2   :  { %v1163_v2 = vpack.c.bf16 %v1153_v1, %v1152_v58  ;;  %v2764_v58 = vld [vmem:[%s3504_s7 + $0x128] sm:$0xff]   ;;  %v2765_v1 = vld [vmem:[%s3504_s7 + $0x170] sm:$0xff]  }
 0x9a3   :  { %2545 = vmatpush3.bf16.msra.mxu0 %v2762_v63 }
 0x9a4   :  { %2640 = vmatmul.mubr.msk.bf16.vlgmr.msra.gmra.mrb[16].mxu1 %vm160_vm1, %v1163_v2  ;;  %2546 = vmatprep.subr.bf16.mxu0 %v2763_v55  ;;  %v2766_v2 = vld [vmem:[%s3504_s7 + $0x130] sm:$0xff]  }
 0x9a5   :  { %1374 = vmatprep.mubr.bf16.mxu1 %v2871_v8  ;;  %1343 = vmatpush1.bf16.msra.mxu1 %v2741_v20 }
 0x9a6   :  { %1344 = vmatprep.subr.bf16.mxu1 %v2746_v22 }
 0x9a7   :  { %2547 = vmatpush3.bf16.msra.mxu0 %v2764_v58  ;;  %v2383_v58 = vld [vmem:[%s3506_s8 + $0x2] ss:$0 sm:$0xff] }
 0x9a8   :  { %2548 = vmatprep.subr.bf16.mxu0 %v2765_v1 }
 0x9a9   :  { %1345 = vmatpush1.bf16.msra.mxu1 %v2744_v21 }
 0x9aa   :  { %1346 = vmatprep.subr.bf16.mxu1 %v2749_v23 }
 0x9ab   :  { %2549 = vmatpush3.bf16.msra.mxu0 %v2766_v2 }
 0x9ad   :  { %1347 = vmatpush1.bf16.msra.mxu1 %v2747_v24 }
 0x9ae   :  { %1348 = vmatprep.subr.bf16.mxu1 %v2752_v25 }
 0x9b1   :  { %1349 = vmatpush1.bf16.msra.mxu1 %v2750_v26 }
 0x9b2   :  { %2643 = vmatprep.subr.bf16.mxu1 %v2869_v0 }
 0xa77   :  { %v1225_v3 = vpop.f32.mrb[16].mxu1 }
 0xa78   :  { %v1232_v5 = vadd.f32 %v1225_v3, %v1120_v28  ;;  %v2641_v6 = vpop.f32.mrb[17].mxu1  ;;  %v2767_v3 = vld [vmem:[%s3504_s7 + $0x178] sm:$0xff]  }
 0xa79   :  { %v1228_v7 = vpop.f32.mrb[18].mxu1  ;;  %2550 = vmatprep.subr.bf16.mxu0 %v2767_v3 }
 0xa7a   :  { %v3255_v9 = vadd.f32 %v2315_v4, %v1232_v5  ;;  %v1233_v10 = vadd.f32 %v1228_v7, %v1121_v30  ;;  %v2642_v11 = vpop.f32.mrb[19].mxu1  ;;  %v2324_v5 = vld [vmem:[%s3505_s6 + $0x4] sm:$0x3] }
 0xa7b   :  { %v1292_v6 = vrot.slane %v2324_v5, %v3091_v52  ;;  %v1296_v7 = vrot.slane %v2324_v5, %v3096_v54 }
 0xa7c   :  { %v3257_v12 = vadd.f32 %v2315_v4, %v1233_v10  ;;  %v1244_v13 = vsel %vm160_vm1, %v3255_v9, 0.0  ;;  %v1252_v14 = vmul.f32 %v3255_v9, %v3255_v9  ;;  %v2768_v4 = vld [vmem:[%s3504_s7 + $0x138] sm:$0xff]  }
 0xa7d   :  { %1245 = vadd.xlane.f32.xlu0 %v1244_v13  ;;  %2551 = vmatpush3.bf16.msra.mxu0 %v2768_v4 }
 0xa7e   :  { %v1247_v15 = vsel %vm160_vm1, %v3257_v12, 0.0  ;;  %v1253_v16 = vmul.f32 %v3257_v12, %v3257_v12  ;;  %v1254_v17 = vsel %vm160_vm1, %v1252_v14, 0.0 }
 0xa7f   :  { %1248 = vadd.xlane.f32.xlu1 %v1247_v15 }
 0xa80   :  { %v1257_v18 = vsel %vm160_vm1, %v1253_v16, 0.0 }
 0xa81   :  { %1255 = vadd.xlane.f32.xlu0 %v1254_v17 }
 0xa83   :  { %1258 = vadd.xlane.f32.xlu1 %v1257_v18 }
 0xb0a   :  { %v1246_v27 = vpop.xlane.xlu0 %1245 }
 0xb0b   :  { %v1250_v28 = vmul.f32 0.015625, %v1246_v27 }
 0xb0c   :  { %v1249_v29 = vpop.xlane.xlu1 %1248 }
 0xb0d   :  { %v1251_v30 = vmul.f32 0.015625, %v1249_v29  ;;  %v1262_v33 = vmul.f32 %v1250_v28, %v1250_v28  ;;  %v1268_v44 = vsub.f32 %v3255_v9, %v1250_v28 }
 0xb0e   :  { %v1256_v31 = vpop.xlane.xlu0 %1255 }
 0xb0f   :  { %v1260_v34 = vmul.f32 0.015625, %v1256_v31  ;;  %v1263_v37 = vmul.f32 %v1251_v30, %v1251_v30  ;;  %v1269_v45 = vsub.f32 %v3257_v12, %v1251_v30 }
 0xb10   :  { %v1259_v36 = vpop.xlane.xlu1 %1258 }
 0xb11   :  { %v1264_v38 = vsub.f32 %v1260_v34, %v1262_v33  ;;  %v1261_v32 = vmul.f32 0.015625, %v1259_v36 }
 0xb13   :  { %v1266_v35 = vmax.f32 %v1264_v38, 0.0  ;;  %v1265_v39 = vsub.f32 %v1261_v32, %v1263_v37 }
 0xb15   :  { %v1270_v40 = vadd.f32 1e-05, %v1266_v35  ;;  %v1267_v41 = vmax.f32 %v1265_v39, 0.0 }
 0xb17   :  { %2837 = vrsqrt.f32 %v1270_v40  ;;  %v1271_v42 = vadd.f32 1e-05, %v1267_v41 }
 0xb19   :  { %2839 = vrsqrt.f32 %v1271_v42 }
 0xb21   :  { %v2838_v43 = vpop.eup %2837 }
 0xb22   :  { %v1274_v47 = vmul.f32 %v2838_v43, %v1268_v44 }
 0xb23   :  { %v2840_v46 = vpop.eup %2839 }
 0xb24   :  { %v1275_v48 = vmul.f32 %v2840_v46, %v1269_v45 }
 0xb26   :  { %v1285_v49 = vpack.c.bf16 %v1275_v48, %v1274_v47 }
 0xb28   :  { %2333 = vmatmul.mubr.msk.bf16.vlgmr.msra.gmra.mrb[20].mxu1 %vm160_vm1, %v1285_v49 }
 0xb29   :  { %2651 = vmatprep.mubr.msk.bf16.mxu1 %vm2870_vm0, %v2869_v0 }
 0xbfb   :  { %v1376_v10 = vpop.f32.mrb[20].mxu1 }
 0xbfc   :  { %v1377_v11 = vadd.f32 %v1376_v10, %v1292_v6  ;;  %v1378_v13 = vpop.f32.mrb[21].mxu1 }
 0xbfd   :  { %v1379_v14 = vadd.f32 %v1378_v13, %v1296_v7  ;;  %v1380_v15 = vpop.f32.mrb[22].mxu1 }
 0xbfe   :  { %v1389_v16 = vmul.f32 0.044715, %v1377_v11  ;;  %v1381_v17 = vadd.f32 %v1380_v15, %v1292_v6  ;;  %v1382_v18 = vpop.f32.mrb[23].mxu1  ;;  %v1385_v45 = vmul.f32 0.5, %v1377_v11 }
 0xbff   :  { %v1390_v19 = vmul.f32 0.044715, %v1379_v14  ;;  %v1383_v20 = vadd.f32 %v1382_v18, %v1296_v7  ;;  %v1386_v48 = vmul.f32 0.5, %v1379_v14 }
 0xc00   :  { %v1393_v21 = vmul.f32 %v1389_v16, %v1377_v11  ;;  %v1391_v22 = vmul.f32 0.044715, %v1381_v17  ;;  %v1387_v46 = vmul.f32 0.5, %v1381_v17  ;;  %v2771_v16 = vld [vmem:[%s3501_s3 + $0x70] sm:$0xff]  }
 0xc01   :  { %v1394_v23 = vmul.f32 %v1390_v19, %v1379_v14  ;;  %v1392_v24 = vmul.f32 0.044715, %v1383_v20  ;;  %v1388_v49 = vmul.f32 0.5, %v1383_v20 }
 0xc02   :  { %v1397_v25 = vmul.f32 %v1393_v21, %v1377_v11  ;;  %v1395_v26 = vmul.f32 %v1391_v22, %v1381_v17 }
 0xc03   :  { %v1398_v27 = vmul.f32 %v1394_v23, %v1379_v14  ;;  %v1396_v28 = vmul.f32 %v1392_v24, %v1383_v20 }
 0xc04   :  { %v1401_v29 = vadd.f32 %v1397_v25, %v1377_v11  ;;  %v1399_v30 = vmul.f32 %v1395_v26, %v1381_v17 }
 0xc05   :  { %v1400_v31 = vmul.f32 %v1396_v28, %v1383_v20  ;;  %v1402_v33 = vadd.f32 %v1398_v27, %v1379_v14 }
 0xc06   :  { %v1405_v34 = vmul.f32 0.7978846, %v1401_v29  ;;  %v1403_v36 = vadd.f32 %v1399_v30, %v1381_v17  ;;  %v2772_v17 = vld [vmem:[%s3501_s3 + $0x78] sm:$0xff]  }
 0xc07   :  { %v1404_v37 = vadd.f32 %v1400_v31, %v1383_v20  ;;  %v1406_v38 = vmul.f32 0.7978846, %v1402_v33 }
 0xc08   :  { %2841 = vtanh.f32 %v1405_v34  ;;  %v1407_v32 = vmul.f32 0.7978846, %v1403_v36 }
 0xc09   :  { %v1408_v35 = vmul.f32 0.7978846, %v1404_v37  ;;  %2843 = vtanh.f32 %v1406_v38 }
 0xc0a   :  { %2845 = vtanh.f32 %v1407_v32 }
 0xc0b   :  { %2847 = vtanh.f32 %v1408_v35 }
 0xc12   :  { %v2842_v39 = vpop.eup %2841 }
 0xc13   :  { %v2844_v40 = vpop.eup %2843  ;;  %v1413_v41 = vadd.f32 1.0, %v2842_v39 }
 0xc14   :  { %v2846_v42 = vpop.eup %2845  ;;  %v1414_v43 = vadd.f32 1.0, %v2844_v40 }
 0xc15   :  { %v2848_v44 = vpop.eup %2847  ;;  %v1415_v47 = vadd.f32 1.0, %v2846_v42  ;;  %v1417_v51 = vmul.f32 %v1413_v41, %v1385_v45  ;;  %v2398_v42 = vld [vmem:[%s3502_s4 + $0x3] ss:$0 sm:$0xff] }
 0xc16   :  { %v1416_v50 = vadd.f32 1.0, %v2848_v44  ;;  %v1418_v56 = vmul.f32 %v1414_v43, %v1386_v48 }
 0xc17   :  { %v1419_v53 = vmul.f32 %v1415_v47, %v1387_v46 }
 0xc18   :  { %v1420_v57 = vmul.f32 %v1416_v50, %v1388_v49 }
 0xc19   :  { %v1421_v59 = vpack.c.bf16 %v1419_v53, %v1417_v51 }
 0xc1a   :  { %v1422_v60 = vpack.c.bf16 %v1420_v57, %v1418_v56 }
 0xc1c   :  { %1584 = vmatprep.mubr.bf16.mxu0 %v1422_v60  ;;  %v2773_v60 = vld [vmem:[%s3503_s5 + $0xc0] ss:$8 sps:$4 sm:$0xff]  }
 0xc1d   :  { %1585 = vmatmul.mubr.bf16.vlgmr.msra.gmra.mrb[12].mxu0 %v1421_v59  ;;  %v2775_v59 = vld [vmem:[%s3503_s5 + $0xc4] ss:$8 sps:$4 sm:$0xff]  }
 0xcf0   :  { %v2552_v61 = vpop.f32.mrb[12].mxu0 }
 0xcf1   :  { %v2553_v62 = vpop.f32.mrb[13].mxu0 }
 0xcf2   :  { %v2554_v63 = vadd.f32 %v2553_v62, %v2552_v61  ;;  %v2555_v55 = vpop.f32.mrb[14].mxu0  ;;  %v2776_v61 = vld [vmem:[%s3503_s5 + $0xd0] ss:$8 sps:$4 sm:$0xff]   ;;  %v2778_v62 = vld [vmem:[%s3503_s5 + $0xd4] ss:$8 sps:$4 sm:$0xff]  }
 0xcf3   :  { %v2556_v1 = vpop.f32.mrb[15].mxu0 }
 0xcf4   :  { %v1593_v2 = vadd.f32 %v2554_v63, %v3255_v9  ;;  %v2557_v3 = vadd.f32 %v2556_v1, %v2555_v55  ;;  %v2769_v9 = vld [vmem:[%s3501_s3 + $0x60] sm:$0xff]   ;;  %v2782_v1 = vld [vmem:[%s3503_s5 + $0xf0] ss:$8 sps:$4 sm:$0xff]  }
 0xcf5   :  { %2644 = vmatpush3.bf16.msra.mxu1 %v2769_v9  ;;  %v2781_v63 = vld [vmem:[%s3503_s5 + $0xe4] ss:$8 sps:$4 sm:$0xff]   ;;  %v2779_v55 = vld [vmem:[%s3503_s5 + $0xe0] ss:$8 sps:$4 sm:$0xff]  }
 0xcf6   :  { %v1603_v4 = vadd.f32 %v2383_v58, %v1593_v2  ;;  %v1594_v5 = vadd.f32 %v2557_v3, %v3257_v12  ;;  %v2770_v12 = vld [vmem:[%s3501_s3 + $0x68] sm:$0xff]   ;;  %2645 = vmatprep.subr.bf16.mxu1 %v2869_v0 }
 0xcf8   :  { %v1604_v6 = vadd.f32 %v2383_v58, %v1594_v5  ;;  %v1605_v7 = vsel %vm160_vm1, %v1603_v4, 0.0  ;;  %v1613_v10 = vmul.f32 %v1603_v4, %v1603_v4  ;;  %v2784_v58 = vld [vmem:[%s3503_s5 + $0xf4] ss:$8 sps:$4 sm:$0xff]  }
 0xcf9   :  { %1606 = vadd.xlane.f32.xlu0 %v1605_v7  ;;  %2646 = vmatpush3.bf16.msra.mxu1 %v2770_v12 }
 0xcfa   :  { %v1608_v11 = vsel %vm160_vm1, %v1604_v6, 0.0  ;;  %v1614_v13 = vmul.f32 %v1604_v6, %v1604_v6  ;;  %v1615_v14 = vsel %vm160_vm1, %v1613_v10, 0.0  ;;  %2647 = vmatprep.subr.bf16.mxu1 %v2869_v0 }
 0xcfb   :  { %1609 = vadd.xlane.f32.xlu1 %v1608_v11 }
 0xcfc   :  { %v1618_v15 = vsel %vm160_vm1, %v1614_v13, 0.0 }
 0xcfd   :  { %1616 = vadd.xlane.f32.xlu0 %v1615_v14  ;;  %2648 = vmatpush3.bf16.msra.mxu1 %v2771_v16 }
 0xcfe   :  { %2649 = vmatprep.subr.bf16.mxu1 %v2869_v0 }
 0xcff   :  { %1619 = vadd.xlane.f32.xlu1 %v1618_v15 }
 0xd01   :  { %2650 = vmatpush3.bf16.msra.mxu1 %v2772_v17 }
 0xd02   :  { %1825 = vmatprep.subr.bf16.mxu1 %v2775_v59 }
 0xd86   :  { %v1607_v18 = vpop.xlane.xlu0 %1606 }
 0xd87   :  { %v1611_v19 = vmul.f32 0.015625, %v1607_v18 }
 0xd88   :  { %v1610_v20 = vpop.xlane.xlu1 %1609 }
 0xd89   :  { %v1612_v21 = vmul.f32 0.015625, %v1610_v20  ;;  %v1623_v23 = vmul.f32 %v1611_v19, %v1611_v19  ;;  %v1629_v37 = vsub.f32 %v1603_v4, %v1611_v19 }
 0xd8a   :  { %v1617_v22 = vpop.xlane.xlu0 %1616 }
 0xd8b   :  { %v1621_v24 = vmul.f32 0.015625, %v1617_v22  ;;  %v1624_v26 = vmul.f32 %v1612_v21, %v1612_v21  ;;  %v1630_v38 = vsub.f32 %v1604_v6, %v1612_v21 }
 0xd8c   :  { %v1620_v25 = vpop.xlane.xlu1 %1619 }
 0xd8d   :  { %v1625_v27 = vsub.f32 %v1621_v24, %v1623_v23  ;;  %v1622_v28 = vmul.f32 0.015625, %v1620_v25 }
 0xd8f   :  { %v1627_v29 = vmax.f32 %v1625_v27, 0.0  ;;  %v1626_v30 = vsub.f32 %v1622_v28, %v1624_v26  ;;  %v2785_v26 = vld [vmem:[%s3504_s7 + $0x1c0] sm:$0xff]   ;;  %v2787_v28 = vld [vmem:[%s3504_s7 + $0x1c8] sm:$0xff]  }
 0xd90   :  { %v2786_v27 = vld [vmem:[%s3504_s7 + $0x180] sm:$0xff]   ;;  %2563 = vmatprep.subr.bf16.mxu0 %v2785_v26 }
 0xd91   :  { %v1631_v31 = vadd.f32 1e-05, %v1627_v29  ;;  %v1628_v33 = vmax.f32 %v1626_v30, 0.0  ;;  %2564 = vmatpush3.bf16.msra.mxu0 %v2786_v27  ;;  %v2788_v29 = vld [vmem:[%s3504_s7 + $0x188] sm:$0xff]   ;;  %v2790_v30 = vld [vmem:[%s3504_s7 + $0x190] sm:$0xff]  }
 0xd92   :  { %2565 = vmatprep.subr.bf16.mxu0 %v2787_v28 }
 0xd93   :  { %2849 = vrsqrt.f32 %v1631_v31  ;;  %v1632_v34 = vadd.f32 1e-05, %v1628_v33  ;;  %v2791_v31 = vld [vmem:[%s3504_s7 + $0x1d8] sm:$0xff]  }
 0xd94   :  { %v2792_v33 = vld [vmem:[%s3504_s7 + $0x198] sm:$0xff]  }
 0xd95   :  { %2851 = vrsqrt.f32 %v1632_v34  ;;  %2566 = vmatpush3.bf16.msra.mxu0 %v2788_v29  ;;  %v2793_v34 = vld [vmem:[%s3504_s7 + $0x1e0] sm:$0xff]  }
 0xd9d   :  { %v2850_v36 = vpop.eup %2849 }
 0xd9e   :  { %v1635_v35 = vmul.f32 %v2850_v36, %v1629_v37  ;;  %v2794_v36 = vld [vmem:[%s3504_s7 + $0x1a0] sm:$0xff]   ;;  %v2795_v37 = vld [vmem:[%s3504_s7 + $0x1e8] sm:$0xff]  }
 0xd9f   :  { %v2852_v32 = vpop.eup %2851 }
 0xda0   :  { %v1636_v39 = vmul.f32 %v2852_v32, %v1630_v38  ;;  %v2796_v38 = vld [vmem:[%s3504_s7 + $0x1a8] sm:$0xff]   ;;  %v2797_v32 = vld [vmem:[%s3504_s7 + $0x1f0] sm:$0xff]  }
 0xda2   :  { %v1646_v40 = vpack.c.bf16 %v1636_v39, %v1635_v35  ;;  %v2798_v35 = vld [vmem:[%s3504_s7 + $0x1b0] sm:$0xff]   ;;  %v2799_v39 = vld [vmem:[%s3504_s7 + $0x1f8] sm:$0xff]  }
 0xda4   :  { %2652 = vmatmul.mubr.msk.bf16.vlgmr.msra.gmra.mrb[24].mxu1 %vm160_vm1, %v1646_v40  ;;  %v2800_v40 = vld [vmem:[%s3504_s7 + $0x1b8] sm:$0xff]  }
 0xda5   :  { %1857 = vmatprep.mubr.bf16.mxu1 %v2871_v8  ;;  %1826 = vmatpush1.bf16.msra.mxu1 %v2773_v60 }
 0xda6   :  { %1827 = vmatprep.subr.bf16.mxu1 %v2778_v62 }
 0xda9   :  { %1828 = vmatpush1.bf16.msra.mxu1 %v2776_v61 }
 0xdaa   :  { %1829 = vmatprep.subr.bf16.mxu1 %v2781_v63 }
 0xdad   :  { %1830 = vmatpush1.bf16.msra.mxu1 %v2779_v55 }
 0xdae   :  { %1831 = vmatprep.subr.bf16.mxu1 %v2784_v58 }
 0xdb1   :  { %1832 = vmatpush1.bf16.msra.mxu1 %v2782_v1 }
 0xdb2   :  { %2655 = vmatprep.subr.bf16.mxu1 %v2869_v0 }
 0xe77   :  { %v1708_v41 = vpop.f32.mrb[24].mxu1 }
 0xe78   :  { %v1715_v43 = vadd.f32 %v1708_v41, %v1603_v4  ;;  %v2653_v44 = vpop.f32.mrb[25].mxu1  ;;  %v2407_v41 = vld [vmem:[%s3505_s6 + $0x6] sm:$0x3] }
 0xe79   :  { %v1711_v45 = vpop.f32.mrb[26].mxu1 }
 0xe7a   :  { %v3381_v46 = vadd.f32 %v2398_v42, %v1715_v43  ;;  %v1716_v47 = vadd.f32 %v1711_v45, %v1604_v6  ;;  %v2654_v48 = vpop.f32.mrb[27].mxu1  ;;  %v1779_v43 = vrot.slane %v2407_v41, %v3096_v54 }
 0xe7c   :  { %v3383_v49 = vadd.f32 %v2398_v42, %v1716_v47  ;;  %v1727_v50 = vsel %vm160_vm1, %v3381_v46, 0.0  ;;  %v1735_v8 = vmul.f32 %v3381_v46, %v3381_v46  ;;  %v1775_v42 = vrot.slane %v2407_v41, %v3091_v52 }
 0xe7d   :  { %1728 = vadd.xlane.f32.xlu0 %v1727_v50 }
 0xe7e   :  { %v1730_v51 = vsel %vm160_vm1, %v3383_v49, 0.0  ;;  %v1736_v53 = vmul.f32 %v3383_v49, %v3383_v49  ;;  %v1737_v56 = vsel %vm160_vm1, %v1735_v8, 0.0 }
 0xe7f   :  { %1731 = vadd.xlane.f32.xlu1 %v1730_v51 }
 0xe80   :  { %v1740_v57 = vsel %vm160_vm1, %v1736_v53, 0.0 }
 0xe81   :  { %1738 = vadd.xlane.f32.xlu0 %v1737_v56 }
 0xe83   :  { %1741 = vadd.xlane.f32.xlu1 %v1740_v57 }
 0xf0a   :  { %v1729_v2 = vpop.xlane.xlu0 %1728 }
 0xf0b   :  { %v1733_v3 = vmul.f32 0.015625, %v1729_v2 }
 0xf0c   :  { %v1732_v4 = vpop.xlane.xlu1 %1731 }
 0xf0d   :  { %v1734_v5 = vmul.f32 0.015625, %v1732_v4  ;;  %v1745_v7 = vmul.f32 %v1733_v3, %v1733_v3  ;;  %v1751_v20 = vsub.f32 %v3381_v46, %v1733_v3 }
 0xf0e   :  { %v1739_v6 = vpop.xlane.xlu0 %1738 }
 0xf0f   :  { %v1743_v10 = vmul.f32 0.015625, %v1739_v6  ;;  %v1746_v13 = vmul.f32 %v1734_v5, %v1734_v5  ;;  %v1752_v21 = vsub.f32 %v3383_v49, %v1734_v5 }
 0xf10   :  { %v1742_v11 = vpop.xlane.xlu1 %1741 }
 0xf11   :  { %v1747_v14 = vsub.f32 %v1743_v10, %v1745_v7  ;;  %v1744_v15 = vmul.f32 0.015625, %v1742_v11 }
 0xf13   :  { %v1749_v9 = vmax.f32 %v1747_v14, 0.0  ;;  %v1748_v12 = vsub.f32 %v1744_v15, %v1746_v13 }
 0xf15   :  { %v1753_v16 = vadd.f32 1e-05, %v1749_v9  ;;  %v1750_v17 = vmax.f32 %v1748_v12, 0.0 }
 0xf17   :  { %2853 = vrsqrt.f32 %v1753_v16  ;;  %v1754_v18 = vadd.f32 1e-05, %v1750_v17 }
 0xf19   :  { %2855 = vrsqrt.f32 %v1754_v18 }
 0xf21   :  { %v2854_v19 = vpop.eup %2853 }
 0xf22   :  { %v1757_v23 = vmul.f32 %v2854_v19, %v1751_v20 }
 0xf23   :  { %v2856_v22 = vpop.eup %2855 }
 0xf24   :  { %v1758_v24 = vmul.f32 %v2856_v22, %v1752_v21 }
 0xf26   :  { %v1768_v25 = vpack.c.bf16 %v1758_v24, %v1757_v23 }
 0xf28   :  { %2416 = vmatmul.mubr.msk.bf16.vlgmr.msra.gmra.mrb[28].mxu1 %vm160_vm1, %v1768_v25 }
 0xf29   :  { %2657 = vmatprep.mubr.msk.bf16.mxu1 %vm2870_vm0, %v2869_v0  ;;  %v2789_v0 = vld [vmem:[%s3504_s7 + $0x1d0] sm:$0xff]  }
 0xf2a   :  { %2567 = vmatprep.subr.bf16.mxu0 %v2789_v0 }
 0xf2b   :  { %2568 = vmatpush3.bf16.msra.mxu0 %v2790_v30 }
 0xf2c   :  { %2569 = vmatprep.subr.bf16.mxu0 %v2791_v31 }
 0xf2f   :  { %2570 = vmatpush3.bf16.msra.mxu0 %v2792_v33  ;;  %v2466_v33 = vld [vmem:[%s3506_s8 + $0x3] ss:$0 sm:$0xff] }
 0xf30   :  { %2571 = vmatprep.subr.bf16.mxu0 %v2793_v34 }
 0xf33   :  { %2572 = vmatpush3.bf16.msra.mxu0 %v2794_v36 }
 0xf34   :  { %2573 = vmatprep.subr.bf16.mxu0 %v2795_v37 }
 0xf37   :  { %2574 = vmatpush3.bf16.msra.mxu0 %v2796_v38 }
 0xf38   :  { %2575 = vmatprep.subr.bf16.mxu0 %v2797_v32 }
 0xf3b   :  { %2576 = vmatpush3.bf16.msra.mxu0 %v2798_v35 }
 0xf3c   :  { %2577 = vmatprep.subr.bf16.mxu0 %v2799_v39 }
 0xf3f   :  { %2578 = vmatpush3.bf16.msra.mxu0 %v2800_v40 }
 0xffb   :  { %v1859_v44 = vpop.f32.mrb[28].mxu1 }
 0xffc   :  { %v1860_v45 = vadd.f32 %v1859_v44, %v1775_v42  ;;  %v1861_v47 = vpop.f32.mrb[29].mxu1 }
 0xffd   :  { %v1862_v48 = vadd.f32 %v1861_v47, %v1779_v43  ;;  %v1863_v50 = vpop.f32.mrb[30].mxu1 }
 0xffe   :  { %v1872_v8 = vmul.f32 0.044715, %v1860_v45  ;;  %v1864_v51 = vadd.f32 %v1863_v50, %v1775_v42  ;;  %v1865_v53 = vpop.f32.mrb[31].mxu1  ;;  %v1868_v17 = vmul.f32 0.5, %v1860_v45 }
 0xfff   :  { %v1873_v56 = vmul.f32 0.044715, %v1862_v48  ;;  %v1866_v57 = vadd.f32 %v1865_v53, %v1779_v43  ;;  %v1869_v20 = vmul.f32 0.5, %v1862_v48 }
0x1000   :  { %v1876_v59 = vmul.f32 %v1872_v8, %v1860_v45  ;;  %v1874_v60 = vmul.f32 0.044715, %v1864_v51  ;;  %v1870_v18 = vmul.f32 0.5, %v1864_v51 }
0x1001   :  { %v1877_v61 = vmul.f32 %v1873_v56, %v1862_v48  ;;  %v1875_v62 = vmul.f32 0.044715, %v1866_v57  ;;  %v1871_v21 = vmul.f32 0.5, %v1866_v57 }
0x1002   :  { %v1880_v63 = vmul.f32 %v1876_v59, %v1860_v45  ;;  %v1878_v55 = vmul.f32 %v1874_v60, %v1864_v51 }
0x1003   :  { %v1881_v58 = vmul.f32 %v1877_v61, %v1862_v48  ;;  %v1879_v52 = vmul.f32 %v1875_v62, %v1866_v57 }
0x1004   :  { %v1884_v1 = vadd.f32 %v1880_v63, %v1860_v45  ;;  %v1882_v54 = vmul.f32 %v1878_v55, %v1864_v51 }
0x1005   :  { %v1883_v2 = vmul.f32 %v1879_v52, %v1866_v57  ;;  %v1885_v3 = vadd.f32 %v1881_v58, %v1862_v48 }
0x1006   :  { %v1888_v4 = vmul.f32 0.7978846, %v1884_v1  ;;  %v1886_v5 = vadd.f32 %v1882_v54, %v1864_v51 }
0x1007   :  { %v1887_v6 = vadd.f32 %v1883_v2, %v1866_v57  ;;  %v1889_v7 = vmul.f32 0.7978846, %v1885_v3 }
0x1008   :  { %2857 = vtanh.f32 %v1888_v4  ;;  %v1890_v10 = vmul.f32 0.7978846, %v1886_v5  ;;  %v2121_v5 = vld [vmem:[%s3507_s9] sm:$0xf] }
0x1009   :  { %v1891_v11 = vmul.f32 0.7978846, %v1887_v6  ;;  %2859 = vtanh.f32 %v1889_v7  ;;  %v2123_v6 = vstv %s3508_s10 }
0x100a   :  { %2861 = vtanh.f32 %v1890_v10 }
0x100b   :  { %2863 = vtanh.f32 %v1891_v11 }
0x1012   :  { %v2858_v13 = vpop.eup %2857 }
0x1013   :  { %v2860_v14 = vpop.eup %2859  ;;  %v1896_v15 = vadd.f32 1.0, %v2858_v13 }
0x1014   :  { %v2862_v9 = vpop.eup %2861  ;;  %v1897_v12 = vadd.f32 1.0, %v2860_v14 }
0x1015   :  { %v2864_v16 = vpop.eup %2863  ;;  %v1898_v19 = vadd.f32 1.0, %v2862_v9  ;;  %v1900_v23 = vmul.f32 %v1896_v15, %v1868_v17 }
0x1016   :  { %v1899_v22 = vadd.f32 1.0, %v2864_v16  ;;  %v1901_v25 = vmul.f32 %v1897_v12, %v1869_v20 }
0x1017   :  { %v1902_v24 = vmul.f32 %v1898_v19, %v1870_v18 }
0x1018   :  { %v1903_v26 = vmul.f32 %v1899_v22, %v1871_v21 }
0x1019   :  { %v1904_v27 = vpack.c.bf16 %v1902_v24, %v1900_v23 }
0x101a   :  { %v1905_v28 = vpack.c.bf16 %v1903_v26, %v1901_v25 }
0x101c   :  { %2067 = vmatprep.mubr.bf16.mxu0 %v1905_v28 }
0x101d   :  { %2068 = vmatmul.mubr.bf16.vlgmr.msra.gmra.mrb[16].mxu0 %v1904_v27 }
0x10f0   :  { %v2579_v29 = vpop.f32.mrb[16].mxu0 }
0x10f1   :  { %v2580_v0 = vpop.f32.mrb[17].mxu0 }
0x10f2   :  { %v2581_v30 = vadd.f32 %v2580_v0, %v2579_v29  ;;  %v2582_v31 = vpop.f32.mrb[18].mxu0 }
0x10f3   :  { %v2583_v34 = vpop.f32.mrb[19].mxu0 }
0x10f4   :  { %v2076_v36 = vadd.f32 %v2581_v30, %v3381_v46  ;;  %v2584_v37 = vadd.f32 %v2583_v34, %v2582_v31 }
0x10f6   :  { %v2086_v38 = vadd.f32 %v2466_v33, %v2076_v36  ;;  %v2077_v32 = vadd.f32 %v2584_v37, %v3383_v49 }
0x10f8   :  { %v2087_v35 = vadd.f32 %v2466_v33, %v2077_v32  ;;  %v2088_v39 = vsel %vm160_vm1, %v2086_v38, 0.0  ;;  %v2096_v40 = vmul.f32 %v2086_v38, %v2086_v38 }
0x10f9   :  { %2089 = vadd.xlane.f32.xlu0 %v2088_v39 }
0x10fa   :  { %v2091_v41 = vsel %vm160_vm1, %v2087_v35, 0.0  ;;  %v2097_v42 = vmul.f32 %v2087_v35, %v2087_v35  ;;  %v2098_v43 = vsel %vm160_vm1, %v2096_v40, 0.0 }
0x10fb   :  { %2092 = vadd.xlane.f32.xlu1 %v2091_v41 }
0x10fc   :  { %v2101_v44 = vsel %vm160_vm1, %v2097_v42, 0.0 }
0x10fd   :  { %2099 = vadd.xlane.f32.xlu0 %v2098_v43 }
0x10ff   :  { %2102 = vadd.xlane.f32.xlu1 %v2101_v44 }
0x1186   :  { %v2090_v46 = vpop.xlane.xlu0 %2089 }
0x1187   :  { %v2094_v45 = vmul.f32 0.015625, %v2090_v46 }
0x1188   :  { %v2093_v47 = vpop.xlane.xlu1 %2092 }
0x1189   :  { %v2095_v48 = vmul.f32 0.015625, %v2093_v47  ;;  %v2106_v50 = vmul.f32 %v2094_v45, %v2094_v45  ;;  %v2112_v58 = vsub.f32 %v2086_v38, %v2094_v45 }
0x118a   :  { %v2100_v49 = vpop.xlane.xlu0 %2099 }
0x118b   :  { %v2104_v8 = vmul.f32 0.015625, %v2100_v49  ;;  %v2107_v53 = vmul.f32 %v2095_v48, %v2095_v48  ;;  %v2113_v52 = vsub.f32 %v2087_v35, %v2095_v48 }
0x118c   :  { %v2103_v51 = vpop.xlane.xlu1 %2102 }
0x118d   :  { %v2108_v56 = vsub.f32 %v2104_v8, %v2106_v50  ;;  %v2105_v57 = vmul.f32 0.015625, %v2103_v51 }
0x118f   :  { %v2110_v59 = vmax.f32 %v2108_v56, 0.0  ;;  %v2109_v60 = vsub.f32 %v2105_v57, %v2107_v53 }
0x1191   :  { %v2114_v61 = vadd.f32 1e-05, %v2110_v59  ;;  %v2111_v62 = vmax.f32 %v2109_v60, 0.0 }
0x1193   :  { %2865 = vrsqrt.f32 %v2114_v61  ;;  %v2115_v63 = vadd.f32 1e-05, %v2111_v62 }
0x1195   :  { %2867 = vrsqrt.f32 %v2115_v63 }
0x119d   :  { %v2866_v55 = vpop.eup %2865 }
0x119e   :  { %v2118_v54 = vmul.f32 %v2866_v55, %v2112_v58 }
0x119f   :  { %v2868_v1 = vpop.eup %2867 }
0x11a0   :  { %v2119_v2 = vmul.f32 %v2868_v1, %v2113_v52 }
0x11a2   :  { %v2120_v3 = vpack.c.bf16 %v2119_v2, %v2118_v54 }
0x11a4   :  { %v2128_v4 = vsel %vm160_vm1, %v2120_v3, 0 }
0x11a5   :  { %2656 = vmatpush3.bf16.xpose.msra.mxu1 %v2128_v4 }
0x11ac   :  { %2658 = vmatmul.mubr.msk.bf16.vlgmr.msra.gmra.mrb[32].mxu1 %vm160_vm1, %v2121_v5 }
0x127f   :  { %v2164_v7 = vpop.f32.mrb[32].mxu1 }
0x1280   :  { %v2165_v10 = vadd.f32 %v2164_v7, %v2123_v6  ;;  %v2659_v11 = vpop.f32.mrb[33].mxu1 }
0x1281   :  { %v2167_v13 = vpop.f32.mrb[34].mxu1 }
0x1282   :  { %2171 = vst.msk [vmem:[%s3509_s11] sm:$0xff] %vm2170_vm2, %v2165_v10  ;;  %v2660_v14 = vpop.f32.mrb[35].mxu1 }

</bundles_post_ra>
